<compile_context>
chip_gen: v7x
topology: tpu7x:2x2x1
jax: 0.10.0
libtpu: 0.0.40
codegen_flags: <defaults>
</compile_context>

<pallas_src>
import jax
import jax.numpy as jnp
from jax.experimental import pallas as pl
from jax.experimental.pallas import tpu as pltpu


def _cdist_kernel(src_ref, tgt_t_ref, out_ref):
    # src_ref:   (1, TN, D)   -- one source tile (lane dim = D, tiny)
    # tgt_t_ref: (1, D, TM)   -- one target tile, pre-transposed (lane dim = TM)
    # out_ref:   (1, TN, TM)  -- lane-dense output tile
    x = src_ref[0]       # (TN, D)  f32
    yt = tgt_t_ref[0]    # (D, TM)  f32
    ncoord = x.shape[1]  # static (2-3)

    # Exact squared-distance accumulation on the VPU; the loop over D unrolls
    # at trace time (D is a static, tiny integer).
    diff = x[:, 0:1] - yt[0:1, :]          # (TN, TM) via broadcast
    d2 = diff * diff
    for k in range(1, ncoord):
        diff = x[:, k : k + 1] - yt[k : k + 1, :]
        d2 = d2 + diff * diff

    # f32 sqrt on the EUP; cast only at the store (no-op for f32 output).
    out_ref[0] = jnp.sqrt(d2).astype(out_ref.dtype)


def _round_up(a, b):
    return (a + b - 1) // b * b


def _cdist_reference(src, tgt, out_dtype):
    d2 = jnp.sum((src[:, :, None, :] - tgt[:, None, :, :]) ** 2, axis=-1)
    return jnp.sqrt(jnp.maximum(d2, 0.0)).astype(out_dtype)


def projector_forward(source_mesh, target_mesh, state=None, *,
                      out_dtype=jnp.float32,
                      tn_cap=1024, tm_cap=2048,
                      small_problem_elems=64 * 1024):
    """Pallas equivalent of Projector.forward: torch.cdist(source, target, p=2)."""
    del state  # unused in the (truncated) reference forward

    # torch .detach() equivalent.
    source_mesh = jax.lax.stop_gradient(source_mesh)
    target_mesh = jax.lax.stop_gradient(target_mesh)

    B, N, D = source_mesh.shape
    Bt, M, Dt = target_mesh.shape
    assert B == Bt and D == Dt, "batch / coord dims must match"

    src = source_mesh.astype(jnp.float32)
    tgt = target_mesh.astype(jnp.float32)

    # Small-problem fallback: for tiny meshes the pallas_call launch cost and
    # the 128-lane padding on M dominate; a plain XLA broadcast-subtract wins.
    if N * M <= small_problem_elems or M < 128 or N < 8:
        return _cdist_reference(src, tgt, out_dtype)

    # Pre-transpose target to (B, D, M): lane-dense on M inside the kernel.
    tgt_t = jnp.swapaxes(tgt, 1, 2)

    # Tile sizes: TN multiple of 8, TM multiple of 128; up to ~8 MiB f32 tile.
    # Ragged last tiles are handled by Pallas (partial masked stores), so no
    # input padding and no output crop are needed.
    TN = min(tn_cap, _round_up(N, 8))
    TM = min(tm_cap, _round_up(M, 128))
    grid = (B, pl.cdiv(N, TN), pl.cdiv(M, TM))

    out = pl.pallas_call(
        _cdist_kernel,
        out_shape=jax.ShapeDtypeStruct((B, N, M), out_dtype),
        grid=grid,
        in_specs=[
            # src block index is constant along j (innermost axis) -> its DMA
            # is issued once per (b, i), not once per inner step. Keep it so.
            pl.BlockSpec((1, TN, D), lambda b, i, j: (b, i, 0)),
            pl.BlockSpec((1, D, TM), lambda b, i, j: (b, 0, j)),
        ],
        out_specs=pl.BlockSpec((1, TN, TM), lambda b, i, j: (b, i, j)),
        compiler_params=pltpu.CompilerParams(
            dimension_semantics=("parallel", "parallel", "parallel"),
            # 2 x 8 MiB output buffers + tiny inputs ~= 17 MiB; 32 MiB leaves
            # headroom and fits v5e's scoped limit and v7x's 64 MiB physical.
            vmem_limit_bytes=32 * 1024 * 1024,
        ),
    )(src, tgt_t)
    return out


if __name__ == "__main__":
    key = jax.random.PRNGKey(0)
    k_src, k_tgt, k_state, k_src2, k_tgt2, k_src3, k_tgt3 = jax.random.split(key, 7)

    # --- Case 1: tiny mesh (exercises the small-problem jnp fallback) --------
    B, N, M, D, F = 2, 16, 24, 2, 4
    source_mesh = jax.random.uniform(k_src, (B, N, D), dtype=jnp.float32)
    target_mesh = jax.random.uniform(k_tgt, (B, M, D), dtype=jnp.float32)
    state = jax.random.normal(k_state, (B, N, F), dtype=jnp.float32)  # unused

    dist = jax.block_until_ready(projector_forward(source_mesh, target_mesh, state))
    ref = _cdist_reference(source_mesh, target_mesh, jnp.float32)
    assert dist.shape == (B, N, M)
    assert jnp.allclose(dist, ref, atol=1e-5), "mismatch (tiny fallback case)"

    # --- Case 2: moderate mesh, tile-aligned (exercises the Pallas kernel) ---
    B2, N2, M2, D2 = 2, 256, 384, 2
    src2 = jax.random.uniform(k_src2, (B2, N2, D2), dtype=jnp.float32)
    tgt2 = jax.random.uniform(k_tgt2, (B2, M2, D2), dtype=jnp.float32)
    dist2 = jax.block_until_ready(projector_forward(src2, tgt2, None))
    ref2 = _cdist_reference(src2, tgt2, jnp.float32)
    assert dist2.shape == (B2, N2, M2)
    assert jnp.allclose(dist2, ref2, atol=1e-5), "mismatch (aligned Pallas case)"

    # --- Case 3: ragged mesh sizes (exercises masked last tiles, D=3) --------
    B3, N3, M3, D3 = 2, 250, 300, 3
    src3 = jax.random.uniform(k_src3, (B3, N3, D3), dtype=jnp.float32)
    tgt3 = jax.random.uniform(k_tgt3, (B3, M3, D3), dtype=jnp.float32)
    dist3 = jax.block_until_ready(projector_forward(src3, tgt3, None))
    ref3 = _cdist_reference(src3, tgt3, jnp.float32)
    assert dist3.shape == (B3, N3, M3)
    assert jnp.allclose(dist3, ref3, atol=1e-5), "mismatch (ragged Pallas case)"

    print("KERNEL_OK")
</pallas_src>

<mosaic_0001>
module attributes {stable_mosaic.version = 11 : i64} {
  func.func @_cdist_kernel(%arg0: i32, %arg1: i32, %arg2: i32, %arg3: memref<1x256x2xf32, #tpu.memory_space<vmem>>, %arg4: memref<1x2x384xf32, #tpu.memory_space<vmem>>, %arg5: memref<1x256x384xf32, #tpu.memory_space<vmem>>) attributes {dimension_semantics = [#tpu.dimension_semantics<parallel>, #tpu.dimension_semantics<parallel>, #tpu.dimension_semantics<parallel>], iteration_bounds = array<i64: 2, 1, 1>, scalar_prefetch = 0 : i64, scratch_operands = 0 : i64, tpu.core_type = #tpu.core_type<tc>, window_params = [{transform_indices = @transform_0, window_bounds = array<i64: 1, 256, 2>}, {transform_indices = @transform_1, window_bounds = array<i64: 1, 2, 384>}, {transform_indices = @transform_2, window_bounds = array<i64: 1, 256, 384>}]} {
    %c0 = arith.constant 0 : index
    %c0_0 = arith.constant 0 : index
    %c0_1 = arith.constant 0 : index
    %0 = vector.load %arg3[%c0, %c0_0, %c0_1] : memref<1x256x2xf32, #tpu.memory_space<vmem>>, vector<1x256x2xf32>
    %1 = vector.shape_cast %0 : vector<1x256x2xf32> to vector<256x2xf32>
    %c0_2 = arith.constant 0 : index
    %c0_3 = arith.constant 0 : index
    %c0_4 = arith.constant 0 : index
    %2 = vector.load %arg4[%c0_2, %c0_3, %c0_4] : memref<1x2x384xf32, #tpu.memory_space<vmem>>, vector<1x2x384xf32>
    %3 = vector.shape_cast %2 : vector<1x2x384xf32> to vector<2x384xf32>
    %4 = vector.extract_strided_slice %1 {offsets = [0, 0], sizes = [256, 1], strides = [1, 1]} : vector<256x2xf32> to vector<256x1xf32>
    %5 = vector.extract_strided_slice %3 {offsets = [0, 0], sizes = [1, 384], strides = [1, 1]} : vector<2x384xf32> to vector<1x384xf32>
    %6 = vector.broadcast %4 : vector<256x1xf32> to vector<256x384xf32>
    %7 = vector.broadcast %5 : vector<1x384xf32> to vector<256x384xf32>
    %8 = arith.subf %6, %7 : vector<256x384xf32>
    %9 = arith.mulf %8, %8 : vector<256x384xf32>
    %10 = vector.extract_strided_slice %1 {offsets = [0, 1], sizes = [256, 1], strides = [1, 1]} : vector<256x2xf32> to vector<256x1xf32>
    %11 = vector.extract_strided_slice %3 {offsets = [1, 0], sizes = [1, 384], strides = [1, 1]} : vector<2x384xf32> to vector<1x384xf32>
    %12 = vector.broadcast %10 : vector<256x1xf32> to vector<256x384xf32>
    %13 = vector.broadcast %11 : vector<1x384xf32> to vector<256x384xf32>
    %14 = arith.subf %12, %13 : vector<256x384xf32>
    %15 = arith.mulf %14, %14 : vector<256x384xf32>
    %16 = arith.addf %9, %15 : vector<256x384xf32>
    %17 = math.sqrt %16 : vector<256x384xf32>
    %c0_5 = arith.constant 0 : index
    %c0_6 = arith.constant 0 : index
    %c0_7 = arith.constant 0 : index
    %18 = vector.load %arg5[%c0_5, %c0_6, %c0_7] : memref<1x256x384xf32, #tpu.memory_space<vmem>>, vector<1x256x384xf32>
    %19 = vector.shape_cast %18 : vector<1x256x384xf32> to vector<256x384xf32>
    %20 = vector.shape_cast %17 : vector<256x384xf32> to vector<1x256x384xf32>
    tpu.vector_store %arg5[%c0_5, %c0_6, %c0_7], %20 {strides = array<i32>} : memref<1x256x384xf32, #tpu.memory_space<vmem>>, vector<1x256x384xf32>,
    return
  }
  func.func @transform_0(%arg0: i32, %arg1: i32, %arg2: i32) -> (i32, i32, i32) {
    %c0_i32 = arith.constant 0 : i32
    %c0_i32_0 = arith.constant 0 : i32
    return %arg0, %arg1, %c0_i32 : i32, i32, i32
  }
  func.func @transform_1(%arg0: i32, %arg1: i32, %arg2: i32) -> (i32, i32, i32) {
    %c0_i32 = arith.constant 0 : i32
    %c0_i32_0 = arith.constant 0 : i32
    return %arg0, %c0_i32, %arg2 : i32, i32, i32
  }
  func.func @transform_2(%arg0: i32, %arg1: i32, %arg2: i32) -> (i32, i32, i32) {
    %c0_i32 = arith.constant 0 : i32
    return %arg0, %arg1, %arg2 : i32, i32, i32
  }
}

</mosaic_0001>

<bundles_post_ra>
// kernel: tpu_custom_call.1
= control target key start
LH: loop header
LB: loop body
LE: loop exit
PB: predicated region body
PF: predicated region fallthrough
CT: control target
= control target key end

     0   :  { %7 = vsyncpa [#allocation3], 0  ;;  %s4540_s0 = inlined_call_operand.vmem [shape: f32[2,256,2], index: 0, kind: input, shape index: {}]   ;;  %s4541_s1 = inlined_call_operand.vmem [shape: f32[2,2,384], index: 1, kind: input, shape index: {}]   ;;  %s4542_s2 = inlined_call_operand.hbm [shape: f32[2,256,384], index: 2, kind: output, shape index: {}]  }
   0x1   :  { %9 = vsyncpa [#allocation3 + $0x1], 0  ;;  %s2334_s9 = smov 0   ;;  %s2336_s10 = smov 0  }
   0x2   :  { %s2338_s11 = smov 0   ;;  %s2340_s12 = smov 0  }
   0x3   :  { %s2342_s13 = smov 0   ;;  %s2344_s14 = smov 0  }
   0x4 LB: > { %s1964_s15 = sadd.s32 4294967295, %s2312_s14   ;;  %s1965_s16 = sadd.s32 4294967294, %s2312_s14   ;;  %s2312_s14 = sphi %s2344_s14, %s15_s14   ;;  %s2308_s13 = sphi %s2342_s13, %s4691_s13   ;;  %s2304_s12 = sphi %s2340_s12, %s4690_s12   ;;  %s2300_s11 = sphi %s2338_s11, %s4689_s11   ;;  %s2296_s10 = sphi %s2336_s10, %s4688_s10   ;;  %s2292_s9 = sphi %s2334_s9, %s4687_s9  }
   0x5   : > { %s34_s17 = sadd.s32 1, %s2308_s13  ;;  %s101_s18 = sadd.s32 1, %s2300_s11 }
   0x6   : > { %p36_p0 = scmp.ge.s32.totalorder %s34_s17, 2  ;;  %p111_p1 = scmp.ne.s32.totalorder %s2300_s11, %s2296_s10 }
   0x7   : > { %p112_p2 = scmp.eq.s32.totalorder %s1964_s15, 1  ;;  %p117_p3 = scmp.ne.s32.totalorder %s2296_s10, %s2292_s9 }
   0x8   : > { %s4693_s17 = smov (%p36_p0, %s34_s17), 0  ;;  %p118_p5 = scmp.eq.s32.totalorder %s1965_s16, 1 }
   0x9   : > { %p2374_p4 = por %p112_p2, %p111_p1  ;;  %s94_s20 = ssub.s32 %s2308_s13, %s4693_s17 }
   0xa   : > { %p1968_p6 = scmp.ge.s32.totalorder %s2312_s14, 1  ;;  %p99_p7 = scmp.eq.s32.totalorder %s94_s20, 0 }
   0xb   : > { %p2381_p8 = por %p118_p5, %p117_p3  ;;  %p162_p9 = scmp.lt.s32.totalorder %s2312_s14, 3 }
   0xc   : > { %s2387_s22 = scalar_select %p99_p7, %s2300_s11, %s101_s18  }
   0xd   : > { %p163_p10 = pnand %p1968_p6, %p162_p9 }
   0xf   : > { %166 = sbr.rel (%p163_p10) target bundleno = 491 (0x1eb), region = 28 }
  0x16   : > { %p198_p11 = scmp.lt.s32.totalorder %s2304_s12, 1  ;;  %v2314_v0 = vmov 0   ;;  %v2315_v33 = vmov 1   ;;  %v413_v34 = vlaneseq  ;;  %s194_s4 = sand.u32 1, %s2296_s10  }
  0x17   : > { %2039 = vset.pattern.permute.xlu1 %v2314_v0  ;;  %2038 = vset.pattern.permute.xlu0 %v2314_v0  ;;  %s3168_s5 = smul.u32 768, %s194_s4  ;;  %s4494_s18 = scalar_lea.sflag [#allocation3], %s194_s4 }
  0x18   : > { %s2391_s23 = scalar_select %p198_p11, %s2304_s12, 1  ;;  %v2448_v35 = vshrl.u32 %v413_v34, 7 }
  0x19   : > { %s3212_s6 = scalar_lea.vmem [#allocation2], %s3168_s5  ;;  %s1978_s7 = smul.u32 12288, %s2304_s12 }
  0x1a   : > { %s1975_s24 = sshll.u32 %s2391_s23, 8  ;;  %s1977_s28 = smul.u32 6, %s2391_s23  ;;  %v415_v36 = vsub.s32 0, %v2448_v35  ;;  %v419_v37 = vsub.s32 2, %v2448_v35  ;;  %v423_v38 = vsub.s32 4, %v2448_v35 }
  0x1b   : > { %s2397_s27 = scalar_lea.vmem %s4540_s0, %s1975_s24  ;;  %s1862_s8 = sshll.u32 %s3212_s6, 4  ;;  %s4488_s8 = int_to_ptr.vmem [resolvable:$true] %s1862_s8 }
  0x1c   : > { %v2400_v1 = vld [vmem:[%s2397_s27 + $0x10] sm:$0xff]  ;;  %v2403_v2 = vld [vmem:[%s2397_s27] sm:$0xff]  ;;  %v2408_v3 = vld [vmem:[%s2397_s27 + $0x18] sm:$0xff]  ;;  %s215_s3 = scalar_lea.vmem %s4541_s1, %s1977_s28  ;;  %s4486_s16 = scalar_lea.hbm %s4542_s2, %s1978_s7 }
  0x1d   : > { %264 = vperm.xlu1 %2039, %v2400_v1   ;;  %254 = vperm.xlu0 %2038, %v2403_v2   ;;  %v220_v4 = vld [vmem:[%s2397_s27 + $0x8] sm:$0xff]  ;;  %v223_v6 = vld [vmem:[%s2397_s27 + $0x20] sm:$0xff]  ;;  %v226_v7 = vld [vmem:[%s2397_s27 + $0x38] sm:$0xff]  ;;  %s2234_s20 = scalar_lea.vmem %s4488_s8, 12288  ;;  %s2316_s23 = smov [#allocation2]  }
  0x1e   : > { %v2413_v5 = vld [vmem:[%s2397_s27 + $0x28] sm:$0xff]  ;;  %v225_v8 = vld [vmem:[%s2397_s27 + $0x30] sm:$0xff]  ;;  %v227_v10 = vld [vmem:[%s2397_s27 + $0x40] sm:$0xff]  ;;  %p2235_p12 = scmp.ne.s32.totalorder %s4488_s8, %s2234_s20  ;;  %s2238_s24 = sshll.u32 %s2316_s23, 4  ;;  %s2239_s24 = int_to_ptr.vmem [resolvable:$false] %s2238_s24 }
  0x1f   : > { %v228_v9 = vld [vmem:[%s2397_s27 + $0x48] sm:$0xff]  ;;  %v230_v11 = vld [vmem:[%s2397_s27 + $0x58] sm:$0xff]  ;;  %v229_v12 = vld [vmem:[%s2397_s27 + $0x50] sm:$0xff]  ;;  %s2240_s25 = scalar_lea.vmem %s2239_s24, 24576  ;;  %p2241_p1 = scmp.lt.s32.totalorder %s4488_s8, %s2239_s24 }
  0x20   : > { %v232_v13 = vld [vmem:[%s2397_s27 + $0x68] sm:$0xff]  ;;  %v231_v14 = vld [vmem:[%s2397_s27 + $0x60] sm:$0xff]  ;;  %v234_v15 = vld [vmem:[%s2397_s27 + $0x78] sm:$0xff]  ;;  %p2236_p13 = pnand %p2235_p12, %p2374_p4  ;;  %p2242_p2 = scmp.lt.s32.totalorder %s2240_s25, %s2234_s20 }
  0x21   : > { %269 = vperm.xlu1 %2039, %v2408_v3   ;;  %259 = vperm.xlu0 %2038, %v220_v4   ;;  %v233_v16 = vld [vmem:[%s2397_s27 + $0x70] sm:$0xff]  ;;  %v236_v17 = vld [vmem:[%s2397_s27 + $0x88] sm:$0xff]  ;;  %v235_v18 = vld [vmem:[%s2397_s27 + $0x80] sm:$0xff] }
  0x22   : > { %v238_v19 = vld [vmem:[%s2397_s27 + $0x98] sm:$0xff]  ;;  %v237_v20 = vld [vmem:[%s2397_s27 + $0x90] sm:$0xff]  ;;  %v240_v21 = vld [vmem:[%s2397_s27 + $0xa8] sm:$0xff]  ;;  %p2237_p0 = pneg %p2236_p13  ;;  %p2243_p3 = por %p2242_p2, %p2241_p1 }
  0x23   : > { %v239_v22 = vld [vmem:[%s2397_s27 + $0xa0] sm:$0xff]  ;;  %v242_v23 = vld [vmem:[%s2397_s27 + $0xb8] sm:$0xff]  ;;  %v241_v24 = vld [vmem:[%s2397_s27 + $0xb0] sm:$0xff] }
  0x24   : > { %v244_v25 = vld [vmem:[%s2397_s27 + $0xc8] sm:$0xff]  ;;  %v243_v26 = vld [vmem:[%s2397_s27 + $0xc0] sm:$0xff]  ;;  %v246_v27 = vld [vmem:[%s2397_s27 + $0xd8] sm:$0xff]  ;;  %p2244_p5 = pnand %p2243_p3, %p2237_p0 }
  0x25   : > { %279 = vperm.xlu1 %2039, %v2413_v5   ;;  %274 = vperm.xlu0 %2038, %v223_v6   ;;  %v245_v28 = vld [vmem:[%s2397_s27 + $0xd0] sm:$0xff]  ;;  %v248_v29 = vld [vmem:[%s2397_s27 + $0xe8] sm:$0xff]  ;;  %v247_v30 = vld [vmem:[%s2397_s27 + $0xe0] sm:$0xff] }
  0x26   : > { %v250_v31 = vld [vmem:[%s2397_s27 + $0xf8] sm:$0xff]  ;;  %v249_v32 = vld [vmem:[%s2397_s27 + $0xf0] sm:$0xff]  ;;  %v2456_v39 = vld [vmem:[%s215_s3] sm:$0x3f] }
  0x27   : > { %v416_v40 = vrot.slane %v2456_v39, %v415_v36  ;;  %v420_v41 = vrot.slane %v2456_v39, %v419_v37  ;;  %v424_v42 = vrot.slane %v2456_v39, %v423_v38  ;;  %v766_v37 = vsub.s32 3, %v2448_v35 }
  0x28   : > { %v770_v38 = vsub.s32 5, %v2448_v35 }
  0x29   : > { %289 = vperm.xlu1 %2039, %v226_v7   ;;  %284 = vperm.xlu0 %2038, %v225_v8   ;;  %v2461_v43 = vrot.slane %v416_v40, %v415_v36  ;;  %v2463_v44 = vrot.slane %v420_v41, %v415_v36  ;;  %v2465_v45 = vrot.slane %v424_v42, %v415_v36  ;;  %v762_v36 = vsub.s32 1, %v2448_v35 }
  0x2b   : > { %v763_v35 = vrot.slane %v2456_v39, %v762_v36 }
  0x2d   : > { %299 = vperm.xlu1 %2039, %v228_v9   ;;  %294 = vperm.xlu0 %2038, %v227_v10  }
  0x31   : > { %309 = vperm.xlu1 %2039, %v230_v11   ;;  %304 = vperm.xlu0 %2038, %v229_v12  }
  0x35   : > { %319 = vperm.xlu1 %2039, %v232_v13   ;;  %314 = vperm.xlu0 %2038, %v231_v14  }
  0x39   : > { %329 = vperm.xlu1 %2039, %v234_v15   ;;  %324 = vperm.xlu0 %2038, %v233_v16  }
  0x3d   : > { %339 = vperm.xlu1 %2039, %v236_v17   ;;  %334 = vperm.xlu0 %2038, %v235_v18  }
  0x41   : > { %349 = vperm.xlu1 %2039, %v238_v19   ;;  %344 = vperm.xlu0 %2038, %v237_v20  }
  0x45   : > { %359 = vperm.xlu1 %2039, %v240_v21   ;;  %354 = vperm.xlu0 %2038, %v239_v22  }
  0x49   : > { %369 = vperm.xlu1 %2039, %v242_v23   ;;  %364 = vperm.xlu0 %2038, %v241_v24  }
  0x4d   : > { %379 = vperm.xlu1 %2039, %v244_v25   ;;  %374 = vperm.xlu0 %2038, %v243_v26  }
  0x51   : > { %389 = vperm.xlu1 %2039, %v246_v27   ;;  %384 = vperm.xlu0 %2038, %v245_v28  }
  0x55   : > { %399 = vperm.xlu1 %2039, %v248_v29   ;;  %394 = vperm.xlu0 %2038, %v247_v30  }
  0x59   : > { %409 = vperm.xlu1 %2039, %v250_v31   ;;  %404 = vperm.xlu0 %2038, %v249_v32  }
  0x5d   : > { %2041 = vset.pattern.permute.xlu1 %v2315_v33  ;;  %2040 = vset.pattern.permute.xlu0 %v2315_v33 }
  0x5e   : > { %637 = vperm.xlu1 %2041, %v220_v4   ;;  %633 = vperm.xlu0 %2040, %v2403_v2  }
  0x62   : > { %641 = vperm.xlu1 %2041, %v2400_v1   ;;  %645 = vperm.xlu0 %2040, %v2408_v3  }
  0x66   : > { %649 = vperm.xlu1 %2041, %v223_v6   ;;  %653 = vperm.xlu0 %2040, %v2413_v5  }
  0x6a   : > { %657 = vperm.xlu1 %2041, %v225_v8   ;;  %661 = vperm.xlu0 %2040, %v226_v7  }
  0x6e   : > { %665 = vperm.xlu1 %2041, %v227_v10   ;;  %669 = vperm.xlu0 %2040, %v228_v9  }
  0x72   : > { %673 = vperm.xlu1 %2041, %v229_v12   ;;  %677 = vperm.xlu0 %2040, %v230_v11  }
  0x76   : > { %681 = vperm.xlu1 %2041, %v231_v14   ;;  %685 = vperm.xlu0 %2040, %v232_v13  }
  0x7a   : > { %689 = vperm.xlu1 %2041, %v233_v16   ;;  %693 = vperm.xlu0 %2040, %v234_v15  }
  0x7e   : > { %697 = vperm.xlu1 %2041, %v235_v18   ;;  %701 = vperm.xlu0 %2040, %v236_v17  }
  0x82   : > { %705 = vperm.xlu1 %2041, %v237_v20   ;;  %709 = vperm.xlu0 %2040, %v238_v19  }
  0x86   : > { %713 = vperm.xlu1 %2041, %v239_v22   ;;  %717 = vperm.xlu0 %2040, %v240_v21  }
  0x8a   : > { %721 = vperm.xlu1 %2041, %v241_v24   ;;  %725 = vperm.xlu0 %2040, %v242_v23  }
  0x8e   : > { %729 = vperm.xlu1 %2041, %v243_v26   ;;  %733 = vperm.xlu0 %2040, %v244_v25  }
  0x92   : > { %737 = vperm.xlu1 %2041, %v245_v28   ;;  %741 = vperm.xlu0 %2040, %v246_v27  }
  0x96   : > { %745 = vperm.xlu1 %2041, %v247_v30   ;;  %749 = vperm.xlu0 %2040, %v248_v29  }
  0x9a   : > { %753 = vperm.xlu1 %2041, %v249_v32   ;;  %757 = vperm.xlu0 %2040, %v250_v31  }
  0x9c   : > { %v265_v46 = vpop.permute.xlu1 %264  ;;  %v255_v47 = vpop.permute.xlu0 %254 }
  0x9d   : > { %v2468_v48 = vsub.f32 %v265_v46, %v2461_v43  ;;  %v2471_v49 = vsub.f32 %v265_v46, %v2463_v44  ;;  %v2474_v50 = vsub.f32 %v265_v46, %v2465_v45  ;;  %v2477_v51 = vsub.f32 %v255_v47, %v2461_v43 }
  0x9e   : > { %v2480_v52 = vsub.f32 %v255_v47, %v2463_v44  ;;  %v2483_v53 = vsub.f32 %v255_v47, %v2465_v45 }
  0xa0   : > { %v270_v54 = vpop.permute.xlu1 %269  ;;  %v2485_v55 = vpop.permute.xlu0 %259 }
  0xa1   : > { %v2488_v56 = vsub.f32 %v270_v54, %v2461_v43  ;;  %v2491_v57 = vsub.f32 %v270_v54, %v2463_v44  ;;  %v2494_v58 = vsub.f32 %v270_v54, %v2465_v45 }
  0xa4   : > { %v280_v59 = vpop.permute.xlu1 %279  ;;  %v275_v60 = vpop.permute.xlu0 %274 }
  0xa5   : > { %v2497_v61 = vsub.f32 %v280_v59, %v2461_v43  ;;  %v2500_v62 = vsub.f32 %v280_v59, %v2463_v44  ;;  %v2503_v63 = vsub.f32 %v280_v59, %v2465_v45  ;;  %v2506_v0 = vsub.f32 %v275_v60, %v2461_v43 }
  0xa6   : > { %v2509_v1 = vsub.f32 %v275_v60, %v2463_v44  ;;  %v2512_v2 = vsub.f32 %v275_v60, %v2465_v45 }
  0xa8   : > { %v290_v3 = vpop.permute.xlu1 %289  ;;  %v285_v4 = vpop.permute.xlu0 %284 }
  0xa9   : > { %v2515_v5 = vsub.f32 %v290_v3, %v2461_v43  ;;  %v2518_v6 = vsub.f32 %v290_v3, %v2463_v44  ;;  %v2521_v7 = vsub.f32 %v290_v3, %v2465_v45  ;;  %v2524_v8 = vsub.f32 %v285_v4, %v2461_v43 }
  0xaa   : > { %v2527_v9 = vsub.f32 %v285_v4, %v2463_v44  ;;  %v2530_v10 = vsub.f32 %v285_v4, %v2465_v45  ;;  %v767_v3 = vrot.slane %v2456_v39, %v766_v37  ;;  %v771_v4 = vrot.slane %v2456_v39, %v770_v38 }
  0xab   : > { %v2628_v39 = vrot.slane %v763_v35, %v762_v36 }
  0xac   : > { %v300_v11 = vpop.permute.xlu1 %299  ;;  %v295_v12 = vpop.permute.xlu0 %294  ;;  %v2630_v38 = vrot.slane %v767_v3, %v762_v36 }
  0xad   : > { %v2533_v13 = vsub.f32 %v300_v11, %v2461_v43  ;;  %v2536_v14 = vsub.f32 %v300_v11, %v2463_v44  ;;  %v2539_v15 = vsub.f32 %v300_v11, %v2465_v45  ;;  %v2542_v16 = vsub.f32 %v295_v12, %v2461_v43 }
  0xae   : > { %v2545_v17 = vsub.f32 %v295_v12, %v2463_v44  ;;  %v2548_v18 = vsub.f32 %v295_v12, %v2465_v45  ;;  %4550 = vst [vmem:[#allocation8_spill] sm:$0xff] %v2630_v38  ;;  %v2676_v38 = vmul.f32 %v2480_v52, %v2480_v52 }
  0xb0   : > { %v310_v19 = vpop.permute.xlu1 %309  ;;  %v305_v20 = vpop.permute.xlu0 %304  ;;  %4556 = vst [vmem:[#allocation14_spill] sm:$0xff] %v2676_v38 }
  0xb1   : > { %v2551_v21 = vsub.f32 %v310_v19, %v2461_v43  ;;  %v2554_v22 = vsub.f32 %v310_v19, %v2463_v44  ;;  %v2557_v23 = vsub.f32 %v310_v19, %v2465_v45  ;;  %v2560_v24 = vsub.f32 %v305_v20, %v2461_v43 }
  0xb2   : > { %v2563_v25 = vsub.f32 %v305_v20, %v2463_v44  ;;  %v2566_v26 = vsub.f32 %v305_v20, %v2465_v45 }
  0xb4   : > { %v320_v27 = vpop.permute.xlu1 %319  ;;  %v315_v28 = vpop.permute.xlu0 %314 }
  0xb5   : > { %v2569_v29 = vsub.f32 %v320_v27, %v2461_v43  ;;  %v2572_v30 = vsub.f32 %v320_v27, %v2463_v44  ;;  %v2575_v31 = vsub.f32 %v320_v27, %v2465_v45  ;;  %v2578_v32 = vsub.f32 %v315_v28, %v2461_v43 }
  0xb6   : > { %v2581_v33 = vsub.f32 %v315_v28, %v2463_v44  ;;  %v2584_v34 = vsub.f32 %v315_v28, %v2465_v45 }
  0xb8   : > { %v330_v40 = vpop.permute.xlu1 %329  ;;  %v325_v41 = vpop.permute.xlu0 %324 }
  0xb9   : > { %v2590_v42 = vsub.f32 %v330_v40, %v2461_v43  ;;  %v2593_v46 = vsub.f32 %v330_v40, %v2463_v44  ;;  %v2596_v47 = vsub.f32 %v330_v40, %v2465_v45  ;;  %v2599_v54 = vsub.f32 %v325_v41, %v2461_v43 }
  0xba   : > { %v2602_v59 = vsub.f32 %v325_v41, %v2463_v44  ;;  %v2605_v60 = vsub.f32 %v325_v41, %v2465_v45  ;;  %v2632_v41 = vrot.slane %v771_v4, %v762_v36  ;;  %v445_v4 = vsub.f32 %v2485_v55, %v2465_v45 }
  0xbc   : > { %v340_v11 = vpop.permute.xlu1 %339  ;;  %v335_v12 = vpop.permute.xlu0 %334  ;;  %4551 = vst [vmem:[#allocation9_spill] sm:$0xff] %v2632_v41  ;;  %v2668_v41 = vmul.f32 %v2474_v50, %v2474_v50  ;;  %v2688_v50 = vmul.f32 %v2491_v57, %v2491_v57 }
  0xbd   : > { %v2611_v19 = vsub.f32 %v340_v11, %v2461_v43  ;;  %v2614_v20 = vsub.f32 %v340_v11, %v2463_v44  ;;  %v2617_v27 = vsub.f32 %v340_v11, %v2465_v45  ;;  %v2620_v28 = vsub.f32 %v335_v12, %v2461_v43 }
  0xbe   : > { %v2623_v40 = vsub.f32 %v335_v12, %v2463_v44  ;;  %v2626_v37 = vsub.f32 %v335_v12, %v2465_v45  ;;  %v2640_v11 = vmul.f32 %v2471_v49, %v2471_v49  ;;  %v444_v49 = vsub.f32 %v2485_v55, %v2463_v44  ;;  %4554 = vst [vmem:[#allocation12_spill] sm:$0xff] %v2668_v41 }
  0xbf   : > { %4547 = vst [vmem:[#allocation5_spill] sm:$0xff] %v2614_v20  ;;  %4548 = vst [vmem:[#allocation6_spill] sm:$0xff] %v2620_v28  ;;  %v2636_v20 = vmul.f32 %v2468_v48, %v2468_v48 }
  0xc0   : > { %4549 = vst [vmem:[#allocation7_spill] sm:$0xff] %v2623_v40  ;;  %4553 = vst [vmem:[#allocation11_spill] sm:$0xff] %v2640_v11  ;;  %v443_v40 = vsub.f32 %v2485_v55, %v2461_v43  ;;  %v350_v28 = vpop.permute.xlu1 %349  ;;  %v345_v12 = vpop.permute.xlu0 %344  ;;  %v2680_v55 = vmul.f32 %v2483_v53, %v2483_v53 }
  0xc1   : > { %4552 = vst [vmem:[#allocation10_spill] sm:$0xff] %v2636_v20  ;;  %v2645_v35 = vsub.f32 %v350_v28, %v2461_v43  ;;  %v2648_v3 = vsub.f32 %v350_v28, %v2463_v44  ;;  %v2651_v36 = vsub.f32 %v350_v28, %v2465_v45  ;;  %v2654_v48 = vsub.f32 %v345_v12, %v2461_v43 }
  0xc2   : > { %v2661_v11 = vsub.f32 %v345_v12, %v2463_v44  ;;  %v2664_v20 = vsub.f32 %v345_v12, %v2465_v45  ;;  %v2672_v28 = vmul.f32 %v2477_v51, %v2477_v51  ;;  %v2684_v12 = vmul.f32 %v2488_v56, %v2488_v56  ;;  %4558 = vst [vmem:[#allocation16_spill] sm:$0xff] %v2688_v50 }
  0xc3   : > { %v2692_v51 = vmul.f32 %v2494_v58, %v2494_v58  ;;  %v2694_v41 = vmul.f32 %v443_v40, %v443_v40  ;;  %v2708_v50 = vmul.f32 %v444_v49, %v444_v49  ;;  %v2710_v58 = vmul.f32 %v445_v4, %v445_v4 }
  0xc4   : > { %4555 = vst [vmem:[#allocation13_spill] sm:$0xff] %v2672_v28  ;;  %4557 = vst [vmem:[#allocation15_spill] sm:$0xff] %v2684_v12  ;;  %v360_v52 = vpop.permute.xlu1 %359  ;;  %v355_v38 = vpop.permute.xlu0 %354  ;;  %v2720_v12 = vmul.f32 %v2497_v61, %v2497_v61  ;;  %v2728_v49 = vmul.f32 %v2503_v63, %v2503_v63  ;;  %v2732_v4 = vmul.f32 %v2506_v0, %v2506_v0 }
  0xc5   : > { %4559 = vst [vmem:[#allocation17_spill] sm:$0xff] %v2692_v51  ;;  %v2697_v28 = vsub.f32 %v360_v52, %v2461_v43  ;;  %v2700_v53 = vsub.f32 %v360_v52, %v2463_v44  ;;  %v2703_v56 = vsub.f32 %v360_v52, %v2465_v45  ;;  %v2706_v57 = vsub.f32 %v355_v38, %v2461_v43 }
  0xc6   : > { %v2713_v40 = vsub.f32 %v355_v38, %v2463_v44  ;;  %v2716_v51 = vsub.f32 %v355_v38, %v2465_v45  ;;  %4560 = vst [vmem:[#allocation18_spill] sm:$0xff] %v2720_v12  ;;  %v2724_v52 = vmul.f32 %v2500_v62, %v2500_v62  ;;  %4562 = vst [vmem:[#allocation20_spill] sm:$0xff] %v2728_v49 }
  0xc7   : > { %v2736_v38 = vmul.f32 %v2509_v1, %v2509_v1  ;;  %v2740_v61 = vmul.f32 %v2512_v2, %v2512_v2  ;;  %v2744_v62 = vmul.f32 %v2515_v5, %v2515_v5  ;;  %v2748_v63 = vmul.f32 %v2518_v6, %v2518_v6 }
  0xc8   : > { %4561 = vst [vmem:[#allocation19_spill] sm:$0xff] %v2724_v52  ;;  %v370_v49 = vpop.permute.xlu1 %369  ;;  %v365_v52 = vpop.permute.xlu0 %364  ;;  %v2764_v5 = vmul.f32 %v2521_v7, %v2521_v7  ;;  %v2768_v6 = vmul.f32 %v2524_v8, %v2524_v8  ;;  %v2786_v7 = vmul.f32 %v2533_v13, %v2533_v13  ;;  %v2790_v8 = vmul.f32 %v2536_v14, %v2536_v14 }
  0xc9   : > { %4563 = vst [vmem:[#allocation21_spill] sm:$0xff] %v2740_v61  ;;  %4564 = vst [vmem:[#allocation22_spill] sm:$0xff] %v2744_v62  ;;  %v2751_v0 = vsub.f32 %v370_v49, %v2461_v43  ;;  %v2754_v1 = vsub.f32 %v370_v49, %v2463_v44  ;;  %v2757_v12 = vsub.f32 %v370_v49, %v2465_v45 }
  0xca   : > { %4565 = vst [vmem:[#allocation23_spill] sm:$0xff] %v2748_v63  ;;  %v2760_v2 = vsub.f32 %v365_v52, %v2461_v43  ;;  %4566 = vst [vmem:[#allocation24_spill] sm:$0xff] %v2764_v5  ;;  %v2771_v63 = vsub.f32 %v365_v52, %v2463_v44  ;;  %v2774_v62 = vsub.f32 %v365_v52, %v2465_v45 }
  0xcb   : > { %v2778_v49 = vmul.f32 %v2527_v9, %v2527_v9  ;;  %v2782_v61 = vmul.f32 %v2530_v10, %v2530_v10  ;;  %4567 = vst [vmem:[#allocation25_spill] sm:$0xff] %v2786_v7  ;;  %4568 = vst [vmem:[#allocation26_spill] sm:$0xff] %v2790_v8  ;;  %v2794_v52 = vmul.f32 %v2539_v15, %v2539_v15 }
  0xcc   : > { %v2798_v9 = vmul.f32 %v2542_v16, %v2542_v16  ;;  %v2802_v10 = vmul.f32 %v2545_v17, %v2545_v17  ;;  %v2806_v13 = vmul.f32 %v2548_v18, %v2548_v18  ;;  %v380_v7 = vpop.permute.xlu1 %379  ;;  %v375_v5 = vpop.permute.xlu0 %374  ;;  %v2822_v17 = vmul.f32 %v2551_v21, %v2551_v21 }
  0xcd   : > { %4569 = vst [vmem:[#allocation27_spill] sm:$0xff] %v2794_v52  ;;  %v2809_v14 = vsub.f32 %v380_v7, %v2461_v43  ;;  %v2812_v15 = vsub.f32 %v380_v7, %v2463_v44  ;;  %v2815_v52 = vsub.f32 %v380_v7, %v2465_v45  ;;  %v2818_v16 = vsub.f32 %v375_v5, %v2461_v43 }
  0xce   : > { %4570 = vst [vmem:[#allocation28_spill] sm:$0xff] %v2802_v10  ;;  %4571 = vst [vmem:[#allocation29_spill] sm:$0xff] %v2806_v13  ;;  %v2826_v18 = vmul.f32 %v2554_v22, %v2554_v22  ;;  %v2829_v8 = vsub.f32 %v375_v5, %v2463_v44  ;;  %v2832_v13 = vsub.f32 %v375_v5, %v2465_v45 }
  0xcf   : > { %v2836_v7 = vmul.f32 %v2557_v23, %v2557_v23  ;;  %v2840_v10 = vmul.f32 %v2560_v24, %v2560_v24  ;;  %v2844_v21 = vmul.f32 %v2563_v25, %v2563_v25  ;;  %v2848_v22 = vmul.f32 %v2566_v26, %v2566_v26 }
  0xd0   : > { %4572 = vst [vmem:[#allocation30_spill] sm:$0xff] %v2826_v18  ;;  %v2852_v5 = vmul.f32 %v2569_v29, %v2569_v29  ;;  %v2856_v23 = vmul.f32 %v2572_v30, %v2572_v30  ;;  %v2860_v24 = vmul.f32 %v2575_v31, %v2575_v31  ;;  %v2864_v25 = vmul.f32 %v2578_v32, %v2578_v32  ;;  %v385_v18 = vpop.permute.xlu0 %384 }
  0xd1   : > { %4573 = vst [vmem:[#allocation31_spill] sm:$0xff] %v2836_v7  ;;  %v390_v7 = vpop.permute.xlu1 %389  ;;  %v2876_v30 = vsub.f32 %v385_v18, %v2461_v43  ;;  %v2880_v31 = vmul.f32 %v2581_v33, %v2581_v33  ;;  %v2884_v32 = vmul.f32 %v2584_v34, %v2584_v34  ;;  %v2902_v33 = vmul.f32 %v2596_v47, %v2596_v47 }
  0xd2   : > { %4574 = vst [vmem:[#allocation32_spill] sm:$0xff] %v2852_v5  ;;  %4575 = vst [vmem:[#allocation33_spill] sm:$0xff] %v2856_v23  ;;  %v2867_v26 = vsub.f32 %v390_v7, %v2461_v43  ;;  %v2870_v29 = vsub.f32 %v390_v7, %v2463_v44  ;;  %v2873_v5 = vsub.f32 %v390_v7, %v2465_v45 }
  0xd3   : > { %4576 = vst [vmem:[#allocation34_spill] sm:$0xff] %v2860_v24  ;;  %4577 = vst [vmem:[#allocation35_spill] sm:$0xff] %v2864_v25  ;;  %v2887_v24 = vsub.f32 %v385_v18, %v2463_v44  ;;  %v2890_v23 = vsub.f32 %v385_v18, %v2465_v45  ;;  %v2894_v7 = vmul.f32 %v2590_v42, %v2590_v42 }
  0xd4   : > { %4578 = vst [vmem:[#allocation36_spill] sm:$0xff] %v2884_v32  ;;  %v2898_v25 = vmul.f32 %v2593_v46, %v2593_v46  ;;  %4581 = vst [vmem:[#allocation39_spill] sm:$0xff] %v2902_v33  ;;  %v2906_v34 = vmul.f32 %v2599_v54, %v2599_v54  ;;  %v2910_v18 = vmul.f32 %v2602_v59, %v2602_v59 }
  0xd5   : > { %4579 = vst [vmem:[#allocation37_spill] sm:$0xff] %v2894_v7  ;;  %v2914_v42 = vmul.f32 %v2605_v60, %v2605_v60  ;;  %v2918_v46 = vmul.f32 %v2611_v19, %v2611_v19  ;;  %v400_v33 = vpop.permute.xlu1 %399  ;;  %v395_v7 = vpop.permute.xlu0 %394  ;;  %v2938_v19 = vmul.f32 %v2617_v27, %v2617_v27  ;;  %v2956_v32 = vmul.f32 %v2626_v37, %v2626_v37 }
  0xd6   : > { %4580 = vst [vmem:[#allocation38_spill] sm:$0xff] %v2898_v25  ;;  %4582 = vst [vmem:[#allocation40_spill] sm:$0xff] %v2906_v34  ;;  %v4586_v25 = vld [vmem:[#allocation5_spill] sm:$0xff]  ;;  %v2925_v54 = vsub.f32 %v400_v33, %v2461_v43  ;;  %v2928_v59 = vsub.f32 %v400_v33, %v2463_v44  ;;  %v2934_v60 = vsub.f32 %v395_v7, %v2461_v43  ;;  %v4590_v34 = vld [vmem:[#allocation7_spill] sm:$0xff] }
  0xd7   : > { %4583 = vst [vmem:[#allocation41_spill] sm:$0xff] %v2910_v18  ;;  %4584 = vst [vmem:[#allocation42_spill] sm:$0xff] %v2914_v42  ;;  %v2922_v47 = vmul.f32 %v4586_v25, %v4586_v25  ;;  %v2931_v18 = vsub.f32 %v400_v33, %v2465_v45  ;;  %v4589_v25 = vld [vmem:[#allocation6_spill] sm:$0xff]  ;;  %v2948_v42 = vsub.f32 %v395_v7, %v2465_v45 }
  0xd8   : > { %4585 = vst [vmem:[#allocation43_spill] sm:$0xff] %v2918_v46  ;;  %4588 = vst [vmem:[#allocation44_spill] sm:$0xff] %v2938_v19  ;;  %v2945_v46 = vsub.f32 %v395_v7, %v2463_v44  ;;  %v2952_v33 = vmul.f32 %v4590_v34, %v4590_v34  ;;  %v2960_v27 = vmul.f32 %v2645_v35, %v2645_v35 }
  0xd9   : > { %4587 = vst [vmem:[#allocation5_spill] sm:$0xff] %v2922_v47  ;;  %v2942_v47 = vmul.f32 %v4589_v25, %v4589_v25  ;;  %v2964_v25 = vmul.f32 %v2648_v3, %v2648_v3  ;;  %v2968_v7 = vmul.f32 %v2651_v36, %v2651_v36  ;;  %v2972_v34 = vmul.f32 %v2654_v48, %v2654_v48  ;;  %v405_v19 = vpop.permute.xlu0 %404 }
  0xda   : > { %4591 = vst [vmem:[#allocation6_spill] sm:$0xff] %v2960_v27  ;;  %v2976_v37 = vmul.f32 %v2661_v11, %v2661_v11  ;;  %v2980_v35 = vmul.f32 %v2664_v20, %v2664_v20  ;;  %v410_v27 = vpop.permute.xlu1 %409  ;;  %v530_v48 = vsub.f32 %v405_v19, %v2461_v43  ;;  %v2994_v11 = vmul.f32 %v2697_v28, %v2697_v28 }
  0xdb   : > { %4592 = vst [vmem:[#allocation7_spill] sm:$0xff] %v2964_v25  ;;  %4593 = vst [vmem:[#allocation45_spill] sm:$0xff] %v2968_v7  ;;  %v2983_v3 = vsub.f32 %v410_v27, %v2461_v43  ;;  %v2986_v36 = vsub.f32 %v410_v27, %v2463_v44  ;;  %v2989_v7 = vsub.f32 %v410_v27, %v2465_v45  ;;  %v4605_v27 = vld [vmem:[#allocation8_spill] sm:$0xff] }
  0xdc   : > { %v2998_v20 = vmul.f32 %v2700_v53, %v2700_v53  ;;  %v531_v25 = vsub.f32 %v405_v19, %v2463_v44  ;;  %v3010_v43 = vmul.f32 %v2706_v57, %v2706_v57  ;;  %v3014_v28 = vmul.f32 %v2713_v40, %v2713_v40 }
  0xdd   : > { %4594 = vst [vmem:[#allocation46_spill] sm:$0xff] %v2983_v3  ;;  %4595 = vst [vmem:[#allocation47_spill] sm:$0xff] %v2986_v36  ;;  %v3002_v3 = vsub.f32 %v405_v19, %v2465_v45  ;;  %v3006_v36 = vmul.f32 %v2703_v56, %v2703_v56  ;;  %v3018_v53 = vmul.f32 %v2716_v51, %v2716_v51  ;;  %v634_v19 = vpop.permute.xlu0 %633 }
  0xde   : > { %4596 = vst [vmem:[#allocation48_spill] sm:$0xff] %v2989_v7  ;;  %v3022_v44 = vmul.f32 %v2751_v0, %v2751_v0  ;;  %v3026_v45 = vmul.f32 %v2754_v1, %v2754_v1  ;;  %v3030_v56 = vmul.f32 %v2757_v12, %v2757_v12  ;;  %v3034_v57 = vmul.f32 %v2760_v2, %v2760_v2  ;;  %v638_v1 = vpop.permute.xlu1 %637 }
  0xdf   : > { %4597 = vst [vmem:[#allocation49_spill] sm:$0xff] %v3002_v3  ;;  %v3038_v51 = vmul.f32 %v2771_v63, %v2771_v63  ;;  %v3042_v40 = vmul.f32 %v2774_v62, %v2774_v62  ;;  %v3046_v0 = vmul.f32 %v2809_v14, %v2809_v14  ;;  %v3050_v12 = vmul.f32 %v2812_v15, %v2812_v15  ;;  %v4606_v63 = vld [vmem:[#allocation9_spill] sm:$0xff] }
  0xe0   : > { %4598 = vst [vmem:[#allocation50_spill] sm:$0xff] %v3022_v44  ;;  %4599 = vst [vmem:[#allocation51_spill] sm:$0xff] %v3026_v45  ;;  %v790_v2 = vsub.f32 %v638_v1, %v2628_v39  ;;  %v791_v7 = vsub.f32 %v638_v1, %v4605_v27  ;;  %v792_v3 = vsub.f32 %v638_v1, %v4606_v63 }
  0xe1   : > { %4600 = vst [vmem:[#allocation52_spill] sm:$0xff] %v3030_v56  ;;  %4601 = vst [vmem:[#allocation53_spill] sm:$0xff] %v3038_v51  ;;  %v787_v56 = vsub.f32 %v634_v19, %v2628_v39  ;;  %v3058_v62 = vmul.f32 %v2815_v52, %v2815_v52  ;;  %v3062_v14 = vmul.f32 %v2818_v16, %v2818_v16 }
  0xe2   : > { %4602 = vst [vmem:[#allocation54_spill] sm:$0xff] %v3042_v40  ;;  %4603 = vst [vmem:[#allocation55_spill] sm:$0xff] %v3046_v0  ;;  %v788_v15 = vsub.f32 %v634_v19, %v4605_v27  ;;  %v886_v0 = vmul.f32 %v790_v2, %v790_v2  ;;  %v887_v45 = vmul.f32 %v791_v7, %v791_v7 }
  0xe3   : > { %4604 = vst [vmem:[#allocation56_spill] sm:$0xff] %v3050_v12  ;;  %4607 = vst [vmem:[#allocation8_spill] sm:$0xff] %v3058_v62  ;;  %v789_v12 = vsub.f32 %v634_v19, %v4606_v63  ;;  %v888_v44 = vmul.f32 %v792_v3, %v792_v3  ;;  %v883_v40 = vmul.f32 %v787_v56, %v787_v56 }
  0xe4   : > { %v3068_v1 = vmul.f32 %v2829_v8, %v2829_v8  ;;  %v3072_v52 = vmul.f32 %v2832_v13, %v2832_v13  ;;  %v884_v62 = vmul.f32 %v788_v15, %v788_v15  ;;  %v3076_v16 = vmul.f32 %v2867_v26, %v2867_v26 }
  0xe5   : > { %v885_v51 = vmul.f32 %v789_v12, %v789_v12  ;;  %v3079_v19 = vadd.f32 %v886_v0, %v2694_v41  ;;  %v3082_v7 = vadd.f32 %v887_v45, %v2708_v50  ;;  %v3085_v3 = vadd.f32 %v888_v44, %v2710_v58  ;;  %v4612_v41 = vld [vmem:[#allocation13_spill] sm:$0xff]  ;;  %v642_v50 = vpop.permute.xlu1 %641 }
  0xe6   : > { %4608 = vst [vmem:[#allocation9_spill] sm:$0xff] %v3076_v16  ;;  %v3089_v8 = vmul.f32 %v2870_v29, %v2870_v29  ;;  %v3093_v13 = vmul.f32 %v2873_v5, %v2873_v5  ;;  %v3097_v26 = vmul.f32 %v2876_v30, %v2876_v30  ;;  %v3100_v56 = vadd.f32 %v883_v40, %v4612_v41  ;;  %v4615_v5 = vld [vmem:[#allocation14_spill] sm:$0xff] }
  0xe7   : > { %v3104_v58 = vmul.f32 %v2887_v24, %v2887_v24  ;;  %v3108_v29 = vmul.f32 %v2890_v23, %v2890_v23  ;;  %2042 = vrsqrt.f32 %v3079_v19  ;;  %v3112_v44 = vadd.f32 %v884_v62, %v4615_v5  ;;  %v4624_v5 = vld [vmem:[#allocation10_spill] sm:$0xff] }
  0xe8   : > { %4609 = vst [vmem:[#allocation57_spill] sm:$0xff] %v3089_v8  ;;  %4610 = vst [vmem:[#allocation58_spill] sm:$0xff] %v3093_v13  ;;  %v3116_v30 = vmul.f32 %v2925_v54, %v2925_v54  ;;  %v3120_v45 = vmul.f32 %v2928_v59, %v2928_v59  ;;  %2044 = vrsqrt.f32 %v3082_v7  ;;  %v3124_v24 = vadd.f32 %v885_v51, %v2680_v55 }
  0xe9   : > { %4611 = vst [vmem:[#allocation59_spill] sm:$0xff] %v3097_v26  ;;  %4613 = vst [vmem:[#allocation13_spill] sm:$0xff] %v3104_v58  ;;  %v3128_v23 = vmul.f32 %v2931_v18, %v2931_v18  ;;  %2046 = vrsqrt.f32 %v3085_v3  ;;  %v793_v40 = vsub.f32 %v642_v50, %v2628_v39  ;;  %v794_v54 = vsub.f32 %v642_v50, %v4605_v27 }
  0xea   : > { %4614 = vst [vmem:[#allocation60_spill] sm:$0xff] %v3108_v29  ;;  %4616 = vst [vmem:[#allocation14_spill] sm:$0xff] %v3116_v30  ;;  %v3135_v59 = vmul.f32 %v2934_v60, %v2934_v60  ;;  %v3139_v0 = vmul.f32 %v2945_v46, %v2945_v46  ;;  %v3143_v55 = vmul.f32 %v2948_v42, %v2948_v42  ;;  %2048 = vrsqrt.f32 %v3100_v56  ;;  %v646_v60 = vpop.permute.xlu0 %645 }
  0xeb   : > { %4617 = vst [vmem:[#allocation61_spill] sm:$0xff] %v3120_v45  ;;  %4618 = vst [vmem:[#allocation62_spill] sm:$0xff] %v3128_v23  ;;  %v3146_v18 = vmul.f32 %v530_v48, %v530_v48  ;;  %v3148_v51 = vmul.f32 %v531_v25, %v531_v25  ;;  %vm1098_vm0 = vcmp.eq.f32.partialorder %v3079_v19, inf  ;;  %2050 = vrsqrt.f32 %v3112_v44  ;;  %v650_v45 = vpop.permute.xlu1 %649 }
  0xec   : > { %4619 = vst [vmem:[#allocation63_spill] sm:$0xff] %v3135_v59  ;;  %4620 = vst [vmem:[#allocation64_spill] sm:$0xff] %v3139_v0  ;;  %vm1100_vm1 = vcmp.eq.f32.partialorder %v3079_v19, 0.0  ;;  %v1101_v46 = vand.u32 2147483648, %v3079_v19  ;;  %vm1105_vm2 = vcmp.eq.f32.partialorder %v3082_v7, inf  ;;  %v1108_v42 = vand.u32 2147483648, %v3082_v7 }
  0xed   : > { %4621 = vst [vmem:[#allocation65_spill] sm:$0xff] %v3143_v55  ;;  %4622 = vst [vmem:[#allocation66_spill] sm:$0xff] %v3146_v18  ;;  %2052 = vrsqrt.f32 %v3124_v24  ;;  %vm1107_vm3 = vcmp.eq.f32.partialorder %v3082_v7, 0.0  ;;  %vm1112_vm4 = vcmp.eq.f32.partialorder %v3085_v3, inf  ;;  %v795_v25 = vsub.f32 %v642_v50, %v4606_v63 }
  0xee   : > { %4623 = vst [vmem:[#allocation67_spill] sm:$0xff] %v3148_v51  ;;  %v889_v48 = vmul.f32 %v793_v40, %v793_v40  ;;  %v890_v12 = vmul.f32 %v794_v54, %v794_v54  ;;  %vm1114_vm5 = vcmp.eq.f32.partialorder %v3085_v3, 0.0  ;;  %v1115_v2 = vand.u32 2147483648, %v3085_v3  ;;  %v4625_v40 = vld [vmem:[#allocation11_spill] sm:$0xff] }
  0xef   : > { %vm1077_vm6 = vcmp.eq.f32.partialorder %v3100_v56, inf  ;;  %v1080_v62 = vand.u32 2147483648, %v3100_v56  ;;  %v796_v15 = vsub.f32 %v646_v60, %v2628_v39  ;;  %vm1079_vm7 = vcmp.eq.f32.partialorder %v3100_v56, 0.0 }
  0xf0   : > { %v891_v41 = vmul.f32 %v795_v25, %v795_v25  ;;  %v3172_v50 = vadd.f32 %v889_v48, %v4624_v5  ;;  %v3175_v54 = vadd.f32 %v890_v12, %v4625_v40  ;;  %v797_v51 = vsub.f32 %v646_v60, %v4605_v27  ;;  %v4626_v25 = vld [vmem:[#allocation12_spill] sm:$0xff] }
  0xf1   : > { %vm1084_vm8 = vcmp.eq.f32.partialorder %v3112_v44, inf  ;;  %vm1086_vm9 = vcmp.eq.f32.partialorder %v3112_v44, 0.0  ;;  %v1087_v18 = vand.u32 2147483648, %v3112_v44  ;;  %v798_v23 = vsub.f32 %v646_v60, %v4606_v63  ;;  %v2043_v30 = vpop.eup %2042 }
  0xf2   : > { %vm1091_vm10 = vcmp.eq.f32.partialorder %v3124_v24, inf  ;;  %vm1093_vm11 = vcmp.eq.f32.partialorder %v3124_v24, 0.0  ;;  %v3185_v48 = vadd.f32 %v891_v41, %v4626_v25  ;;  %2054 = vrsqrt.f32 %v3172_v50  ;;  %v2045_v12 = vpop.eup %2044 }
  0xf3   : > { %v1097_v5 = vmul.f32 %v2043_v30, %v3079_v19  ;;  %v1094_v40 = vand.u32 2147483648, %v3124_v24  ;;  %2056 = vrsqrt.f32 %v3175_v54  ;;  %v892_v55 = vmul.f32 %v796_v15, %v796_v15  ;;  %v2047_v60 = vpop.eup %2046 }
  0xf4   : > { %v1104_v0 = vmul.f32 %v2045_v12, %v3082_v7  ;;  %2058 = vrsqrt.f32 %v3185_v48  ;;  %v893_v59 = vmul.f32 %v797_v51, %v797_v51  ;;  %v799_v41 = vsub.f32 %v650_v45, %v2628_v39  ;;  %v2049_v25 = vpop.eup %2048 }
  0xf5   : > { %v1099_v13 = vsel %vm1098_vm0, %v3079_v19, %v1097_v5  ;;  %v1111_v30 = vmul.f32 %v2047_v60, %v3085_v3  ;;  %v894_v8 = vmul.f32 %v798_v23, %v798_v23  ;;  %v800_v16 = vsub.f32 %v650_v45, %v4605_v27  ;;  %v2051_v15 = vpop.eup %2050 }
  0xf6   : > { %v1102_v12 = vsel %vm1100_vm1, %v1101_v46, %v1099_v13  ;;  %v1106_v51 = vsel %vm1105_vm2, %v3082_v7, %v1104_v0  ;;  %v1076_v29 = vmul.f32 %v2049_v25, %v3100_v56  ;;  %v801_v58 = vsub.f32 %v650_v45, %v4606_v63  ;;  %v4627_v13 = vld [vmem:[#allocation15_spill] sm:$0xff] }
  0xf7   : > { %v2053_v26 = vpop.eup %2052  ;;  %v1109_v5 = vsel %vm1107_vm3, %v1108_v42, %v1106_v51  ;;  %v1113_v23 = vsel %vm1112_vm4, %v3085_v3, %v1111_v30  ;;  %1750 = vst [vmem:[%s3212_s6 + $0x18] sm:$0xff] %v1102_v12  ;;  %v1083_v19 = vmul.f32 %v2051_v15, %v3112_v44  ;;  %v3217_v0 = vadd.f32 %v892_v55, %v4627_v13  ;;  %v4628_v42 = vld [vmem:[#allocation16_spill] sm:$0xff] }
  0xf8   : > { %v1116_v7 = vsel %vm1114_vm5, %v1115_v2, %v1113_v23  ;;  %1751 = vst [vmem:[%s3212_s6 + $0x20] sm:$0xff] %v1109_v5  ;;  %v1078_v45 = vsel %vm1077_vm6, %v3100_v56, %v1076_v29  ;;  %v1090_v46 = vmul.f32 %v2053_v26, %v3124_v24  ;;  %v3227_v60 = vadd.f32 %v893_v59, %v4628_v42  ;;  %v4629_v2 = vld [vmem:[#allocation17_spill] sm:$0xff]  ;;  %v654_v5 = vpop.permute.xlu0 %653 }
  0xf9   : > { %1752 = vst [vmem:[%s3212_s6 + $0x28] sm:$0xff] %v1116_v7  ;;  %v1081_v55 = vsel %vm1079_vm7, %v1080_v62, %v1078_v45  ;;  %v1085_v3 = vsel %vm1084_vm8, %v3112_v44, %v1083_v19  ;;  %v3236_v25 = vadd.f32 %v894_v8, %v4629_v2  ;;  %2060 = vrsqrt.f32 %v3217_v0 }
  0xfa   : > { %v1088_v26 = vsel %vm1086_vm9, %v1087_v18, %v1085_v3  ;;  %v1092_v29 = vsel %vm1091_vm10, %v3124_v24, %v1090_v46  ;;  %1747 = vst [vmem:[%s3212_s6] sm:$0xff] %v1081_v55  ;;  %vm1119_vm12 = vcmp.eq.f32.partialorder %v3172_v50, inf  ;;  %v895_v56 = vmul.f32 %v799_v41, %v799_v41 }
  0xfb   : > { %v1095_v59 = vsel %vm1093_vm11, %v1094_v40, %v1092_v29  ;;  %1748 = vst [vmem:[%s3212_s6 + $0x8] sm:$0xff] %v1088_v26  ;;  %vm1121_vm13 = vcmp.eq.f32.partialorder %v3172_v50, 0.0  ;;  %v1122_v8 = vand.u32 2147483648, %v3172_v50  ;;  %2062 = vrsqrt.f32 %v3227_v60 }
  0xfc   : > { %v2055_v44 = vpop.eup %2054  ;;  %1749 = vst [vmem:[%s3212_s6 + $0x10] sm:$0xff] %v1095_v59  ;;  %vm1126_vm14 = vcmp.eq.f32.partialorder %v3175_v54, inf  ;;  %vm1128_vm15 = vcmp.eq.f32.partialorder %v3175_v54, 0.0  ;;  %v1129_v18 = vand.u32 2147483648, %v3175_v54  ;;  %2064 = vrsqrt.f32 %v3236_v25 }
  0xfd   : > { %v2057_v62 = vpop.eup %2056  ;;  %v1118_v24 = vmul.f32 %v2055_v44, %v3172_v50  ;;  %vm1133_vm0 = vcmp.eq.f32.partialorder %v3185_v48, inf  ;;  %vm1135_vm1 = vcmp.eq.f32.partialorder %v3185_v48, 0.0  ;;  %v896_v40 = vmul.f32 %v800_v16, %v800_v16 }
  0xfe   : > { %v2059_v41 = vpop.eup %2058  ;;  %v1125_v30 = vmul.f32 %v2057_v62, %v3175_v54  ;;  %v1136_v15 = vand.u32 2147483648, %v3185_v48  ;;  %v897_v12 = vmul.f32 %v801_v58, %v801_v58  ;;  %v3263_v51 = vadd.f32 %v895_v56, %v2732_v4  ;;  %v4630_v58 = vld [vmem:[#allocation21_spill] sm:$0xff] }
  0xff   : > { %v1120_v23 = vsel %vm1119_vm12, %v3172_v50, %v1118_v24  ;;  %v1132_v19 = vmul.f32 %v2059_v41, %v3185_v48  ;;  %vm1140_vm2 = vcmp.eq.f32.partialorder %v3217_v0, inf  ;;  %v3271_v16 = vadd.f32 %v896_v40, %v2736_v38 }
 0x100   : > { %v1123_v13 = vsel %vm1121_vm13, %v1122_v8, %v1120_v23  ;;  %v1127_v4 = vsel %vm1126_vm14, %v3175_v54, %v1125_v30  ;;  %v3279_v7 = vadd.f32 %v897_v12, %v4630_v58  ;;  %2066 = vrsqrt.f32 %v3263_v51  ;;  %v658_v54 = vpop.permute.xlu1 %657  ;;  %v4631_v12 = vld [vmem:[#allocation18_spill] sm:$0xff]  ;;  %v4632_v23 = vld [vmem:[#allocation19_spill] sm:$0xff] }
 0x101   : > { %v1130_v45 = vsel %vm1128_vm15, %v1129_v18, %v1127_v4  ;;  %v1134_v38 = vsel %vm1133_vm0, %v3185_v48, %v1132_v19  ;;  %1753 = vst [vmem:[%s3212_s6 + $0x30] sm:$0xff] %v1123_v13  ;;  %v802_v50 = vsub.f32 %v654_v5, %v2628_v39  ;;  %v803_v46 = vsub.f32 %v654_v5, %v4605_v27  ;;  %v4633_v4 = vld [vmem:[#allocation20_spill] sm:$0xff] }
 0x102   : > { %v1137_v42 = vsel %vm1135_vm1, %v1136_v15, %v1134_v38  ;;  %1754 = vst [vmem:[%s3212_s6 + $0x38] sm:$0xff] %v1130_v45  ;;  %vm1142_vm3 = vcmp.eq.f32.partialorder %v3217_v0, 0.0  ;;  %v1143_v55 = vand.u32 2147483648, %v3217_v0  ;;  %2068 = vrsqrt.f32 %v3271_v16 }
 0x103   : > { %v2061_v3 = vpop.eup %2060  ;;  %1755 = vst [vmem:[%s3212_s6 + $0x40] sm:$0xff] %v1137_v42  ;;  %vm1147_vm4 = vcmp.eq.f32.partialorder %v3227_v60, inf  ;;  %vm1149_vm5 = vcmp.eq.f32.partialorder %v3227_v60, 0.0  ;;  %v1150_v2 = vand.u32 2147483648, %v3227_v60  ;;  %2070 = vrsqrt.f32 %v3279_v7 }
 0x104   : > { %v1139_v48 = vmul.f32 %v2061_v3, %v3217_v0  ;;  %vm1154_vm6 = vcmp.eq.f32.partialorder %v3236_v25, inf  ;;  %vm1156_vm7 = vcmp.eq.f32.partialorder %v3236_v25, 0.0  ;;  %v804_v26 = vsub.f32 %v654_v5, %v4606_v63 }
 0x105   : > { %v2063_v29 = vpop.eup %2062  ;;  %v1157_v56 = vand.u32 2147483648, %v3236_v25  ;;  %v898_v59 = vmul.f32 %v802_v50, %v802_v50  ;;  %v899_v8 = vmul.f32 %v803_v46, %v803_v46  ;;  %v805_v44 = vsub.f32 %v658_v54, %v2628_v39 }
 0x106   : > { %v2065_v18 = vpop.eup %2064  ;;  %v1141_v62 = vsel %vm1140_vm2, %v3217_v0, %v1139_v48  ;;  %v1146_v24 = vmul.f32 %v2063_v29, %v3227_v60  ;;  %v900_v40 = vmul.f32 %v804_v26, %v804_v26  ;;  %v806_v41 = vsub.f32 %v658_v54, %v4605_v27 }
 0x107   : > { %v1144_v30 = vsel %vm1142_vm3, %v1143_v55, %v1141_v62  ;;  %v1153_v15 = vmul.f32 %v2065_v18, %v3236_v25  ;;  %v3316_v5 = vadd.f32 %v898_v59, %v4631_v12  ;;  %v3319_v19 = vadd.f32 %v899_v8, %v4632_v23 }
 0x108   : > { %v1148_v13 = vsel %vm1147_vm4, %v3227_v60, %v1146_v24  ;;  %1756 = vst [vmem:[%s3212_s6 + $0x48] sm:$0xff] %v1144_v30  ;;  %vm1161_vm8 = vcmp.eq.f32.partialorder %v3263_v51, inf  ;;  %v3327_v0 = vadd.f32 %v900_v40, %v4633_v4  ;;  %v807_v58 = vsub.f32 %v658_v54, %v4606_v63 }
 0x109   : > { %v1151_v45 = vsel %vm1149_vm5, %v1150_v2, %v1148_v13  ;;  %v1155_v38 = vsel %vm1154_vm6, %v3236_v25, %v1153_v15  ;;  %2072 = vrsqrt.f32 %v3316_v5  ;;  %v901_v50 = vmul.f32 %v805_v44, %v805_v44  ;;  %v662_v2 = vpop.permute.xlu0 %661 }
 0x10a   : > { %v2067_v46 = vpop.eup %2066  ;;  %v1158_v42 = vsel %vm1156_vm7, %v1157_v56, %v1155_v38  ;;  %1757 = vst [vmem:[%s3212_s6 + $0x50] sm:$0xff] %v1151_v45  ;;  %vm1163_vm9 = vcmp.eq.f32.partialorder %v3263_v51, 0.0  ;;  %2074 = vrsqrt.f32 %v3319_v19  ;;  %v902_v55 = vmul.f32 %v806_v41, %v806_v41 }
 0x10b   : > { %1758 = vst [vmem:[%s3212_s6 + $0x58] sm:$0xff] %v1158_v42  ;;  %v1160_v60 = vmul.f32 %v2067_v46, %v3263_v51  ;;  %v1164_v54 = vand.u32 2147483648, %v3263_v51  ;;  %vm1168_vm10 = vcmp.eq.f32.partialorder %v3271_v16, inf  ;;  %vm1170_vm11 = vcmp.eq.f32.partialorder %v3271_v16, 0.0 }
 0x10c   : > { %v2069_v3 = vpop.eup %2068  ;;  %v1171_v25 = vand.u32 2147483648, %v3271_v16  ;;  %vm1175_vm12 = vcmp.eq.f32.partialorder %v3279_v7, inf  ;;  %vm1177_vm13 = vcmp.eq.f32.partialorder %v3279_v7, 0.0  ;;  %2076 = vrsqrt.f32 %v3327_v0 }
 0x10d   : > { %v2071_v48 = vpop.eup %2070  ;;  %v1162_v26 = vsel %vm1161_vm8, %v3263_v51, %v1160_v60  ;;  %v1167_v29 = vmul.f32 %v2069_v3, %v3271_v16  ;;  %v903_v56 = vmul.f32 %v807_v58, %v807_v58  ;;  %v3355_v59 = vadd.f32 %v901_v50, %v2768_v6 }
 0x10e   : > { %v1165_v8 = vsel %vm1163_vm9, %v1164_v54, %v1162_v26  ;;  %v1174_v44 = vmul.f32 %v2071_v48, %v3279_v7  ;;  %v1178_v18 = vand.u32 2147483648, %v3279_v7  ;;  %v3362_v62 = vadd.f32 %v902_v55, %v2778_v49  ;;  %v4634_v55 = vld [vmem:[#allocation22_spill] sm:$0xff] }
 0x10f   : > { %v1169_v24 = vsel %vm1168_vm10, %v3271_v16, %v1167_v29  ;;  %1759 = vst [vmem:[%s3212_s6 + $0x60] sm:$0xff] %v1165_v8  ;;  %v3369_v40 = vadd.f32 %v903_v56, %v2782_v61  ;;  %2078 = vrsqrt.f32 %v3355_v59  ;;  %v808_v6 = vsub.f32 %v662_v2, %v2628_v39  ;;  %v666_v16 = vpop.permute.xlu1 %665  ;;  %v4635_v29 = vld [vmem:[#allocation23_spill] sm:$0xff] }
 0x110   : > { %v1172_v51 = vsel %vm1170_vm11, %v1171_v25, %v1169_v24  ;;  %v1176_v49 = vsel %vm1175_vm12, %v3279_v7, %v1174_v44  ;;  %vm1182_vm14 = vcmp.eq.f32.partialorder %v3316_v5, inf  ;;  %vm1184_vm15 = vcmp.eq.f32.partialorder %v3316_v5, 0.0  ;;  %v4636_v44 = vld [vmem:[#allocation24_spill] sm:$0xff] }
 0x111   : > { %v1179_v41 = vsel %vm1177_vm13, %v1178_v18, %v1176_v49  ;;  %1760 = vst [vmem:[%s3212_s6 + $0x68] sm:$0xff] %v1172_v51  ;;  %v1185_v61 = vand.u32 2147483648, %v3316_v5  ;;  %vm1189_vm0 = vcmp.eq.f32.partialorder %v3319_v19, inf  ;;  %2080 = vrsqrt.f32 %v3362_v62 }
 0x112   : > { %1761 = vst [vmem:[%s3212_s6 + $0x70] sm:$0xff] %v1179_v41  ;;  %vm1191_vm1 = vcmp.eq.f32.partialorder %v3319_v19, 0.0  ;;  %v1192_v30 = vand.u32 2147483648, %v3319_v19  ;;  %vm1196_vm2 = vcmp.eq.f32.partialorder %v3327_v0, inf  ;;  %2082 = vrsqrt.f32 %v3369_v40 }
 0x113   : > { %v2073_v15 = vpop.eup %2072  ;;  %vm1198_vm3 = vcmp.eq.f32.partialorder %v3327_v0, 0.0  ;;  %v809_v7 = vsub.f32 %v662_v2, %v4605_v27  ;;  %v810_v12 = vsub.f32 %v662_v2, %v4606_v63  ;;  %v904_v23 = vmul.f32 %v808_v6, %v808_v6 }
 0x114   : > { %v2075_v13 = vpop.eup %2074  ;;  %v1181_v4 = vmul.f32 %v2073_v15, %v3316_v5  ;;  %v811_v58 = vsub.f32 %v666_v16, %v2628_v39  ;;  %v812_v45 = vsub.f32 %v666_v16, %v4605_v27  ;;  %v813_v38 = vsub.f32 %v666_v16, %v4606_v63 }
 0x115   : > { %v1188_v50 = vmul.f32 %v2075_v13, %v3319_v19  ;;  %v905_v46 = vmul.f32 %v809_v7, %v809_v7  ;;  %v906_v42 = vmul.f32 %v810_v12, %v810_v12  ;;  %v3400_v60 = vadd.f32 %v904_v23, %v4634_v55  ;;  %v674_v55 = vpop.permute.xlu1 %673 }
 0x116   : > { %v2077_v54 = vpop.eup %2076  ;;  %v1183_v3 = vsel %vm1182_vm14, %v3316_v5, %v1181_v4  ;;  %v1199_v25 = vand.u32 2147483648, %v3327_v0  ;;  %vm1203_vm4 = vcmp.eq.f32.partialorder %v3355_v59, inf  ;;  %vm1205_vm5 = vcmp.eq.f32.partialorder %v3355_v59, 0.0  ;;  %v4637_v4 = vld [vmem:[#allocation28_spill] sm:$0xff] }
 0x117   : > { %v1186_v2 = vsel %vm1184_vm15, %v1185_v61, %v1183_v3  ;;  %v1190_v48 = vsel %vm1189_vm0, %v3319_v19, %v1188_v50  ;;  %v1195_v26 = vmul.f32 %v2077_v54, %v3327_v0  ;;  %v3415_v56 = vadd.f32 %v905_v46, %v4635_v29 }
 0x118   : > { %v1193_v8 = vsel %vm1191_vm1, %v1192_v30, %v1190_v48  ;;  %1762 = vst [vmem:[%s3212_s6 + $0x78] sm:$0xff] %v1186_v2  ;;  %v3421_v18 = vadd.f32 %v906_v42, %v4636_v44  ;;  %2084 = vrsqrt.f32 %v3400_v60  ;;  %v907_v5 = vmul.f32 %v811_v58, %v811_v58  ;;  %v670_v42 = vpop.permute.xlu0 %669 }
 0x119   : > { %v2079_v24 = vpop.eup %2078  ;;  %v1197_v6 = vsel %vm1196_vm2, %v3327_v0, %v1195_v26  ;;  %1763 = vst [vmem:[%s3212_s6 + $0x80] sm:$0xff] %v1193_v8  ;;  %2086 = vrsqrt.f32 %v3415_v56  ;;  %v908_v51 = vmul.f32 %v812_v45, %v812_v45  ;;  %v909_v49 = vmul.f32 %v813_v38, %v813_v38  ;;  %v4638_v45 = vld [vmem:[#allocation29_spill] sm:$0xff] }
 0x11a   : > { %v1200_v19 = vsel %vm1198_vm3, %v1199_v25, %v1197_v6  ;;  %v1202_v41 = vmul.f32 %v2079_v24, %v3355_v59  ;;  %v1206_v61 = vand.u32 2147483648, %v3355_v59  ;;  %vm1210_vm6 = vcmp.eq.f32.partialorder %v3362_v62, inf }
 0x11b   : > { %v2081_v16 = vpop.eup %2080  ;;  %1764 = vst [vmem:[%s3212_s6 + $0x88] sm:$0xff] %v1200_v19  ;;  %vm1212_vm7 = vcmp.eq.f32.partialorder %v3362_v62, 0.0  ;;  %v1213_v30 = vand.u32 2147483648, %v3362_v62  ;;  %vm1217_vm8 = vcmp.eq.f32.partialorder %v3369_v40, inf  ;;  %2088 = vrsqrt.f32 %v3421_v18 }
 0x11c   : > { %v2083_v15 = vpop.eup %2082  ;;  %v1204_v0 = vsel %vm1203_vm4, %v3355_v59, %v1202_v41  ;;  %v1209_v7 = vmul.f32 %v2081_v16, %v3362_v62  ;;  %vm1219_vm9 = vcmp.eq.f32.partialorder %v3369_v40, 0.0  ;;  %v3445_v12 = vadd.f32 %v907_v5, %v2798_v9 }
 0x11d   : > { %v1207_v23 = vsel %vm1205_vm5, %v1206_v61, %v1204_v0  ;;  %v1216_v13 = vmul.f32 %v2083_v15, %v3369_v40  ;;  %v3451_v58 = vadd.f32 %v908_v51, %v4637_v4  ;;  %v3454_v38 = vadd.f32 %v909_v49, %v4638_v45  ;;  %v4640_v45 = vld [vmem:[#allocation26_spill] sm:$0xff] }
 0x11e   : > { %v1211_v50 = vsel %vm1210_vm6, %v3362_v62, %v1209_v7  ;;  %v1220_v9 = vand.u32 2147483648, %v3369_v40  ;;  %1765 = vst [vmem:[%s3212_s6 + $0x90] sm:$0xff] %v1207_v23  ;;  %vm1224_vm10 = vcmp.eq.f32.partialorder %v3400_v60, inf  ;;  %2090 = vrsqrt.f32 %v3445_v12  ;;  %v4639_v7 = vld [vmem:[#allocation25_spill] sm:$0xff] }
 0x11f   : > { %v1214_v59 = vsel %vm1212_vm7, %v1213_v30, %v1211_v50  ;;  %v1218_v46 = vsel %vm1217_vm8, %v3369_v40, %v1216_v13  ;;  %vm1226_vm11 = vcmp.eq.f32.partialorder %v3400_v60, 0.0  ;;  %2092 = vrsqrt.f32 %v3451_v58 }
 0x120   : > { %v1221_v54 = vsel %vm1219_vm9, %v1220_v9, %v1218_v46  ;;  %1766 = vst [vmem:[%s3212_s6 + $0x98] sm:$0xff] %v1214_v59  ;;  %v1227_v3 = vand.u32 2147483648, %v3400_v60  ;;  %vm1231_vm12 = vcmp.eq.f32.partialorder %v3415_v56, inf  ;;  %vm1233_vm13 = vcmp.eq.f32.partialorder %v3415_v56, 0.0 }
 0x121   : > { %1767 = vst [vmem:[%s3212_s6 + $0xa0] sm:$0xff] %v1221_v54  ;;  %v1234_v62 = vand.u32 2147483648, %v3415_v56  ;;  %vm1238_vm14 = vcmp.eq.f32.partialorder %v3421_v18, inf  ;;  %vm1240_vm15 = vcmp.eq.f32.partialorder %v3421_v18, 0.0  ;;  %2094 = vrsqrt.f32 %v3454_v38 }
 0x122   : > { %v2085_v25 = vpop.eup %2084  ;;  %v814_v40 = vsub.f32 %v670_v42, %v2628_v39  ;;  %v815_v2 = vsub.f32 %v670_v42, %v4605_v27  ;;  %v816_v48 = vsub.f32 %v670_v42, %v4606_v63  ;;  %v817_v26 = vsub.f32 %v674_v55, %v2628_v39 }
 0x123   : > { %v2087_v29 = vpop.eup %2086  ;;  %v1223_v8 = vmul.f32 %v2085_v25, %v3400_v60  ;;  %v1241_v44 = vand.u32 2147483648, %v3421_v18  ;;  %v818_v5 = vsub.f32 %v674_v55, %v4605_v27  ;;  %v819_v24 = vsub.f32 %v674_v55, %v4606_v63  ;;  %v678_v25 = vpop.permute.xlu0 %677 }
 0x124   : > { %v1230_v6 = vmul.f32 %v2087_v29, %v3415_v56  ;;  %v910_v51 = vmul.f32 %v814_v40, %v814_v40  ;;  %v911_v49 = vmul.f32 %v815_v2, %v815_v2  ;;  %v912_v19 = vmul.f32 %v816_v48, %v816_v48 }
 0x125   : > { %v2089_v41 = vpop.eup %2088  ;;  %v1225_v61 = vsel %vm1224_vm10, %v3400_v60, %v1223_v8  ;;  %vm1245_vm0 = vcmp.eq.f32.partialorder %v3445_v12, inf  ;;  %vm1247_vm1 = vcmp.eq.f32.partialorder %v3445_v12, 0.0  ;;  %v913_v16 = vmul.f32 %v817_v26, %v817_v26  ;;  %v4641_v60 = vld [vmem:[#allocation27_spill] sm:$0xff] }
 0x126   : > { %v1228_v30 = vsel %vm1226_vm11, %v1227_v3, %v1225_v61  ;;  %v1232_v15 = vsel %vm1231_vm12, %v3415_v56, %v1230_v6  ;;  %v1237_v0 = vmul.f32 %v2089_v41, %v3421_v18  ;;  %v3502_v23 = vadd.f32 %v910_v51, %v4639_v7 }
 0x127   : > { %v1235_v13 = vsel %vm1233_vm13, %v1234_v62, %v1232_v15  ;;  %1768 = vst [vmem:[%s3212_s6 + $0xa8] sm:$0xff] %v1228_v30  ;;  %v1248_v4 = vand.u32 2147483648, %v3445_v12  ;;  %v3509_v50 = vadd.f32 %v911_v49, %v4640_v45  ;;  %v3512_v9 = vadd.f32 %v912_v19, %v4641_v60 }
 0x128   : > { %v2091_v59 = vpop.eup %2090  ;;  %v1239_v46 = vsel %vm1238_vm14, %v3421_v18, %v1237_v0  ;;  %1769 = vst [vmem:[%s3212_s6 + $0xb0] sm:$0xff] %v1235_v13  ;;  %2096 = vrsqrt.f32 %v3502_v23  ;;  %v914_v56 = vmul.f32 %v818_v5, %v818_v5  ;;  %v915_v42 = vmul.f32 %v819_v24, %v819_v24 }
 0x129   : > { %v2093_v55 = vpop.eup %2092  ;;  %v1242_v54 = vsel %vm1240_vm15, %v1241_v44, %v1239_v46  ;;  %v1244_v3 = vmul.f32 %v2091_v59, %v3445_v12  ;;  %2098 = vrsqrt.f32 %v3509_v50  ;;  %v3524_v62 = vadd.f32 %v913_v16, %v2840_v10 }
 0x12a   : > { %1770 = vst [vmem:[%s3212_s6 + $0xb8] sm:$0xff] %v1242_v54  ;;  %v1251_v40 = vmul.f32 %v2093_v55, %v3451_v58  ;;  %vm1252_vm2 = vcmp.eq.f32.partialorder %v3451_v58, inf  ;;  %vm1254_vm3 = vcmp.eq.f32.partialorder %v3451_v58, 0.0  ;;  %v1255_v2 = vand.u32 2147483648, %v3451_v58 }
 0x12b   : > { %v2095_v18 = vpop.eup %2094  ;;  %v1246_v48 = vsel %vm1245_vm0, %v3445_v12, %v1244_v3  ;;  %vm1259_vm4 = vcmp.eq.f32.partialorder %v3454_v38, inf  ;;  %v1262_v10 = vand.u32 2147483648, %v3454_v38  ;;  %2100 = vrsqrt.f32 %v3512_v9 }
 0x12c   : > { %v1249_v26 = vsel %vm1247_vm1, %v1248_v4, %v1246_v48  ;;  %v1253_v29 = vsel %vm1252_vm2, %v3451_v58, %v1251_v40  ;;  %v1258_v8 = vmul.f32 %v2095_v18, %v3454_v38  ;;  %v820_v44 = vsub.f32 %v678_v25, %v2628_v39 }
 0x12d   : > { %v1256_v5 = vsel %vm1254_vm3, %v1255_v2, %v1253_v29  ;;  %1771 = vst [vmem:[%s3212_s6 + $0xc0] sm:$0xff] %v1249_v26  ;;  %v3544_v24 = vadd.f32 %v914_v56, %v2844_v21  ;;  %v3547_v6 = vadd.f32 %v915_v42, %v2848_v22  ;;  %2102 = vrsqrt.f32 %v3524_v62  ;;  %v682_v21 = vpop.permute.xlu1 %681  ;;  %v4642_v42 = vld [vmem:[#allocation30_spill] sm:$0xff] }
 0x12e   : > { %v1260_v12 = vsel %vm1259_vm4, %v3454_v38, %v1258_v8  ;;  %vm1261_vm5 = vcmp.eq.f32.partialorder %v3454_v38, 0.0  ;;  %1772 = vst [vmem:[%s3212_s6 + $0xc8] sm:$0xff] %v1256_v5  ;;  %vm1266_vm6 = vcmp.eq.f32.partialorder %v3502_v23, inf  ;;  %vm1268_vm7 = vcmp.eq.f32.partialorder %v3502_v23, 0.0  ;;  %v686_v5 = vpop.permute.xlu0 %685 }
 0x12f   : > { %v1263_v58 = vsel %vm1261_vm5, %v1262_v10, %v1260_v12  ;;  %v1269_v51 = vand.u32 2147483648, %v3502_v23  ;;  %vm1273_vm8 = vcmp.eq.f32.partialorder %v3509_v50, inf  ;;  %2104 = vrsqrt.f32 %v3544_v24 }
 0x130   : > { %1773 = vst [vmem:[%s3212_s6 + $0xd0] sm:$0xff] %v1263_v58  ;;  %vm1275_vm9 = vcmp.eq.f32.partialorder %v3509_v50, 0.0  ;;  %v1276_v22 = vand.u32 2147483648, %v3509_v50  ;;  %vm1280_vm10 = vcmp.eq.f32.partialorder %v3512_v9, inf  ;;  %2106 = vrsqrt.f32 %v3547_v6 }
 0x131   : > { %vm1282_vm11 = vcmp.eq.f32.partialorder %v3512_v9, 0.0  ;;  %v821_v38 = vsub.f32 %v678_v25, %v4605_v27  ;;  %v822_v49 = vsub.f32 %v678_v25, %v4606_v63  ;;  %v916_v19 = vmul.f32 %v820_v44, %v820_v44 }
 0x132   : > { %v2097_v41 = vpop.eup %2096  ;;  %v1283_v61 = vand.u32 2147483648, %v3512_v9  ;;  %vm1287_vm12 = vcmp.eq.f32.partialorder %v3524_v62, inf  ;;  %v823_v16 = vsub.f32 %v682_v21, %v2628_v39  ;;  %v824_v30 = vsub.f32 %v682_v21, %v4605_v27 }
 0x133   : > { %v2099_v15 = vpop.eup %2098  ;;  %v1265_v0 = vmul.f32 %v2097_v41, %v3502_v23  ;;  %v917_v7 = vmul.f32 %v821_v38, %v821_v38  ;;  %v918_v13 = vmul.f32 %v822_v49, %v822_v49  ;;  %v3572_v4 = vadd.f32 %v916_v19, %v2822_v17  ;;  %v4643_v17 = vld [vmem:[#allocation31_spill] sm:$0xff] }
 0x134   : > { %v1272_v45 = vmul.f32 %v2099_v15, %v3509_v50  ;;  %vm1289_vm13 = vcmp.eq.f32.partialorder %v3524_v62, 0.0  ;;  %v1290_v60 = vand.u32 2147483648, %v3524_v62  ;;  %v825_v59 = vsub.f32 %v682_v21, %v4606_v63  ;;  %v4644_v38 = vld [vmem:[#allocation35_spill] sm:$0xff] }
 0x135   : > { %v2101_v46 = vpop.eup %2100  ;;  %v1267_v56 = vsel %vm1266_vm6, %v3502_v23, %v1265_v0  ;;  %v3582_v55 = vadd.f32 %v917_v7, %v4642_v42  ;;  %v3585_v54 = vadd.f32 %v918_v13, %v4643_v17  ;;  %2108 = vrsqrt.f32 %v3572_v4  ;;  %v690_v13 = vpop.permute.xlu1 %689 }
 0x136   : > { %v1270_v3 = vsel %vm1268_vm7, %v1269_v51, %v1267_v56  ;;  %v1274_v25 = vsel %vm1273_vm8, %v3509_v50, %v1272_v45  ;;  %v1279_v40 = vmul.f32 %v2101_v46, %v3512_v9  ;;  %vm1294_vm14 = vcmp.eq.f32.partialorder %v3544_v24, inf }
 0x137   : > { %v2103_v2 = vpop.eup %2102  ;;  %v1277_v18 = vsel %vm1275_vm9, %v1276_v22, %v1274_v25  ;;  %1774 = vst [vmem:[%s3212_s6 + $0xd8] sm:$0xff] %v1270_v3  ;;  %2110 = vrsqrt.f32 %v3582_v55  ;;  %v919_v48 = vmul.f32 %v823_v16, %v823_v16  ;;  %v920_v10 = vmul.f32 %v824_v30, %v824_v30 }
 0x138   : > { %v1281_v23 = vsel %vm1280_vm10, %v3512_v9, %v1279_v40  ;;  %1775 = vst [vmem:[%s3212_s6 + $0xe0] sm:$0xff] %v1277_v18  ;;  %v1286_v26 = vmul.f32 %v2103_v2, %v3524_v62  ;;  %vm1296_vm15 = vcmp.eq.f32.partialorder %v3544_v24, 0.0  ;;  %v921_v29 = vmul.f32 %v825_v59, %v825_v59 }
 0x139   : > { %v2105_v8 = vpop.eup %2104  ;;  %v1284_v50 = vsel %vm1282_vm11, %v1283_v61, %v1281_v23  ;;  %v1297_v44 = vand.u32 2147483648, %v3544_v24  ;;  %vm1301_vm0 = vcmp.eq.f32.partialorder %v3547_v6, inf  ;;  %2112 = vrsqrt.f32 %v3585_v54  ;;  %v4645_v61 = vld [vmem:[#allocation36_spill] sm:$0xff] }
 0x13a   : > { %v2107_v12 = vpop.eup %2106  ;;  %1776 = vst [vmem:[%s3212_s6 + $0xe8] sm:$0xff] %v1284_v50  ;;  %v1288_v58 = vsel %vm1287_vm12, %v3524_v62, %v1286_v26  ;;  %v1293_v51 = vmul.f32 %v2105_v8, %v3544_v24  ;;  %vm1303_vm1 = vcmp.eq.f32.partialorder %v3547_v6, 0.0  ;;  %v1304_v9 = vand.u32 2147483648, %v3547_v6  ;;  %v4647_v26 = vld [vmem:[#allocation33_spill] sm:$0xff]  ;;  %v4648_v8 = vld [vmem:[#allocation34_spill] sm:$0xff] }
 0x13b   : > { %v1291_v21 = vsel %vm1289_vm13, %v1290_v60, %v1288_v58  ;;  %v1300_v22 = vmul.f32 %v2107_v12, %v3547_v6  ;;  %v3621_v49 = vadd.f32 %v919_v48, %v4644_v38  ;;  %v3624_v19 = vadd.f32 %v920_v10, %v2880_v31  ;;  %v4646_v10 = vld [vmem:[#allocation32_spill] sm:$0xff]  ;;  %v694_v38 = vpop.permute.xlu0 %693 }
 0x13c   : > { %v1295_v41 = vsel %vm1294_vm14, %v3544_v24, %v1293_v51  ;;  %1777 = vst [vmem:[%s3212_s6 + $0xf0] sm:$0xff] %v1291_v21  ;;  %v3631_v16 = vadd.f32 %v921_v29, %v4645_v61  ;;  %v826_v62 = vsub.f32 %v686_v5, %v2628_v39  ;;  %v827_v30 = vsub.f32 %v686_v5, %v4605_v27 }
 0x13d   : > { %v1298_v15 = vsel %vm1296_vm15, %v1297_v44, %v1295_v41  ;;  %v1302_v31 = vsel %vm1301_vm0, %v3547_v6, %v1300_v22  ;;  %2114 = vrsqrt.f32 %v3621_v49  ;;  %v828_v0 = vsub.f32 %v686_v5, %v4606_v63 }
 0x13e   : > { %v1305_v7 = vsel %vm1303_vm1, %v1304_v9, %v1302_v31  ;;  %1778 = vst [vmem:[%s3212_s6 + $0xf8] sm:$0xff] %v1298_v15  ;;  %vm1308_vm2 = vcmp.eq.f32.partialorder %v3572_v4, inf  ;;  %vm1310_vm3 = vcmp.eq.f32.partialorder %v3572_v4, 0.0  ;;  %2116 = vrsqrt.f32 %v3624_v19  ;;  %v4649_v31 = vld [vmem:[#allocation40_spill] sm:$0xff] }
 0x13f   : > { %v2109_v45 = vpop.eup %2108  ;;  %1779 = vst [vmem:[%s3212_s6 + $0x100] sm:$0xff] %v1305_v7  ;;  %v1311_v24 = vand.u32 2147483648, %v3572_v4  ;;  %vm1315_vm4 = vcmp.eq.f32.partialorder %v3582_v55, inf  ;;  %vm1317_vm5 = vcmp.eq.f32.partialorder %v3582_v55, 0.0  ;;  %2118 = vrsqrt.f32 %v3631_v16  ;;  %v4650_v7 = vld [vmem:[#allocation41_spill] sm:$0xff] }
 0x140   : > { %v1307_v6 = vmul.f32 %v2109_v45, %v3572_v4  ;;  %v1318_v60 = vand.u32 2147483648, %v3582_v55  ;;  %vm1322_vm6 = vcmp.eq.f32.partialorder %v3585_v54, inf  ;;  %vm1324_vm7 = vcmp.eq.f32.partialorder %v3585_v54, 0.0 }
 0x141   : > { %v2111_v59 = vpop.eup %2110  ;;  %v922_v46 = vmul.f32 %v826_v62, %v826_v62  ;;  %v923_v56 = vmul.f32 %v827_v30, %v827_v30  ;;  %v924_v42 = vmul.f32 %v828_v0, %v828_v0  ;;  %v829_v17 = vsub.f32 %v690_v13, %v2628_v39 }
 0x142   : > { %v1309_v3 = vsel %vm1308_vm2, %v3572_v4, %v1307_v6  ;;  %v1314_v25 = vmul.f32 %v2111_v59, %v3582_v55  ;;  %v1325_v40 = vand.u32 2147483648, %v3585_v54  ;;  %v830_v2 = vsub.f32 %v690_v13, %v4605_v27 }
 0x143   : > { %v2113_v18 = vpop.eup %2112  ;;  %v1312_v48 = vsel %vm1310_vm3, %v1311_v24, %v1309_v3  ;;  %v3665_v23 = vadd.f32 %v922_v46, %v4646_v10  ;;  %v3668_v29 = vadd.f32 %v923_v56, %v4647_v26  ;;  %v3671_v50 = vadd.f32 %v924_v42, %v4648_v8  ;;  %v4651_v56 = vld [vmem:[#allocation42_spill] sm:$0xff] }
 0x144   : > { %v1316_v44 = vsel %vm1315_vm4, %v3582_v55, %v1314_v25  ;;  %v1321_v5 = vmul.f32 %v2113_v18, %v3585_v54  ;;  %1780 = vst [vmem:[%s3212_s6 + $0x108] sm:$0xff] %v1312_v48  ;;  %vm1329_vm8 = vcmp.eq.f32.partialorder %v3621_v49, inf  ;;  %v831_v4 = vsub.f32 %v690_v13, %v4606_v63 }
 0x145   : > { %v1319_v12 = vsel %vm1317_vm5, %v1318_v60, %v1316_v44  ;;  %2120 = vrsqrt.f32 %v3665_v23  ;;  %v925_v58 = vmul.f32 %v829_v17, %v829_v17  ;;  %v926_v51 = vmul.f32 %v830_v2, %v830_v2 }
 0x146   : > { %v1323_v9 = vsel %vm1322_vm6, %v3585_v54, %v1321_v5  ;;  %1781 = vst [vmem:[%s3212_s6 + $0x110] sm:$0xff] %v1319_v12  ;;  %vm1331_vm9 = vcmp.eq.f32.partialorder %v3621_v49, 0.0  ;;  %v1332_v21 = vand.u32 2147483648, %v3621_v49  ;;  %2122 = vrsqrt.f32 %v3668_v29 }
 0x147   : > { %v2115_v22 = vpop.eup %2114  ;;  %v1326_v55 = vsel %vm1324_vm7, %v1325_v40, %v1323_v9  ;;  %vm1336_vm10 = vcmp.eq.f32.partialorder %v3624_v19, inf  ;;  %vm1338_vm11 = vcmp.eq.f32.partialorder %v3624_v19, 0.0  ;;  %2124 = vrsqrt.f32 %v3671_v50 }
 0x148   : > { %v2117_v41 = vpop.eup %2116  ;;  %1782 = vst [vmem:[%s3212_s6 + $0x118] sm:$0xff] %v1326_v55  ;;  %v1328_v61 = vmul.f32 %v2115_v22, %v3621_v49  ;;  %v1339_v62 = vand.u32 2147483648, %v3624_v19  ;;  %vm1343_vm12 = vcmp.eq.f32.partialorder %v3631_v16, inf  ;;  %vm1345_vm13 = vcmp.eq.f32.partialorder %v3631_v16, 0.0  ;;  %v4653_v55 = vld [vmem:[#allocation38_spill] sm:$0xff] }
 0x149   : > { %v2119_v54 = vpop.eup %2118  ;;  %v1335_v30 = vmul.f32 %v2117_v41, %v3624_v19  ;;  %v927_v15 = vmul.f32 %v831_v4, %v831_v4  ;;  %v3702_v0 = vadd.f32 %v925_v58, %v4649_v31  ;;  %v3705_v13 = vadd.f32 %v926_v51, %v4650_v7  ;;  %v4652_v51 = vld [vmem:[#allocation37_spill] sm:$0xff] }
 0x14a   : > { %v1330_v45 = vsel %vm1329_vm8, %v3621_v49, %v1328_v61  ;;  %v1342_v24 = vmul.f32 %v2119_v54, %v3631_v16  ;;  %v1346_v6 = vand.u32 2147483648, %v3631_v16  ;;  %v832_v60 = vsub.f32 %v694_v38, %v2628_v39  ;;  %v4654_v54 = vld [vmem:[#allocation39_spill] sm:$0xff] }
 0x14b   : > { %v1333_v59 = vsel %vm1331_vm9, %v1332_v21, %v1330_v45  ;;  %v1337_v46 = vsel %vm1336_vm10, %v3624_v19, %v1335_v30  ;;  %v3719_v42 = vadd.f32 %v927_v15, %v4651_v56  ;;  %2126 = vrsqrt.f32 %v3702_v0  ;;  %v698_v19 = vpop.permute.xlu1 %697 }
 0x14c   : > { %v1340_v17 = vsel %vm1338_vm11, %v1339_v62, %v1337_v46  ;;  %v1344_v3 = vsel %vm1343_vm12, %v3631_v16, %v1342_v24  ;;  %1783 = vst [vmem:[%s3212_s6 + $0x120] sm:$0xff] %v1333_v59  ;;  %vm1350_vm14 = vcmp.eq.f32.partialorder %v3665_v23, inf  ;;  %v833_v49 = vsub.f32 %v694_v38, %v4605_v27 }
 0x14d   : > { %v1347_v25 = vsel %vm1345_vm13, %v1346_v6, %v1344_v3  ;;  %1784 = vst [vmem:[%s3212_s6 + $0x128] sm:$0xff] %v1340_v17  ;;  %vm1352_vm15 = vcmp.eq.f32.partialorder %v3665_v23, 0.0  ;;  %v1353_v40 = vand.u32 2147483648, %v3665_v23  ;;  %2128 = vrsqrt.f32 %v3705_v13 }
 0x14e   : > { %1785 = vst [vmem:[%s3212_s6 + $0x130] sm:$0xff] %v1347_v25  ;;  %vm1357_vm0 = vcmp.eq.f32.partialorder %v3668_v29, inf  ;;  %vm1359_vm1 = vcmp.eq.f32.partialorder %v3668_v29, 0.0  ;;  %v1360_v2 = vand.u32 2147483648, %v3668_v29  ;;  %2130 = vrsqrt.f32 %v3719_v42  ;;  %v702_v25 = vpop.permute.xlu0 %701 }
 0x14f   : > { %v2121_v18 = vpop.eup %2120  ;;  %vm1364_vm2 = vcmp.eq.f32.partialorder %v3671_v50, inf  ;;  %vm1366_vm3 = vcmp.eq.f32.partialorder %v3671_v50, 0.0  ;;  %v834_v16 = vsub.f32 %v694_v38, %v4606_v63  ;;  %v928_v48 = vmul.f32 %v832_v60, %v832_v60 }
 0x150   : > { %v2123_v10 = vpop.eup %2122  ;;  %v1349_v26 = vmul.f32 %v2121_v18, %v3665_v23  ;;  %v1367_v8 = vand.u32 2147483648, %v3671_v50  ;;  %v929_v44 = vmul.f32 %v833_v49, %v833_v49  ;;  %v835_v5 = vsub.f32 %v698_v19, %v2628_v39 }
 0x151   : > { %v2125_v4 = vpop.eup %2124  ;;  %v1356_v12 = vmul.f32 %v2123_v10, %v3668_v29  ;;  %vm1371_vm4 = vcmp.eq.f32.partialorder %v3702_v0, inf  ;;  %v930_v58 = vmul.f32 %v834_v16, %v834_v16  ;;  %v3750_v9 = vadd.f32 %v928_v48, %v4652_v51 }
 0x152   : > { %v1351_v21 = vsel %vm1350_vm14, %v3665_v23, %v1349_v26  ;;  %v1363_v22 = vmul.f32 %v2125_v4, %v3671_v50  ;;  %v3757_v38 = vadd.f32 %v929_v44, %v4653_v55  ;;  %v836_v41 = vsub.f32 %v698_v19, %v4605_v27 }
 0x153   : > { %v1354_v61 = vsel %vm1352_vm15, %v1353_v40, %v1351_v21  ;;  %v1358_v62 = vsel %vm1357_vm0, %v3668_v29, %v1356_v12  ;;  %v3766_v30 = vadd.f32 %v930_v58, %v4654_v54  ;;  %2132 = vrsqrt.f32 %v3750_v9 }
 0x154   : > { %v1361_v15 = vsel %vm1359_vm1, %v1360_v2, %v1358_v62  ;;  %v1365_v31 = vsel %vm1364_vm2, %v3671_v50, %v1363_v22  ;;  %1786 = vst [vmem:[%s3212_s6 + $0x138] sm:$0xff] %v1354_v61  ;;  %v837_v23 = vsub.f32 %v698_v19, %v4606_v63  ;;  %v931_v7 = vmul.f32 %v835_v5, %v835_v5 }
 0x155   : > { %v2127_v45 = vpop.eup %2126  ;;  %v1368_v24 = vsel %vm1366_vm3, %v1367_v8, %v1365_v31  ;;  %1787 = vst [vmem:[%s3212_s6 + $0x140] sm:$0xff] %v1361_v15  ;;  %vm1373_vm5 = vcmp.eq.f32.partialorder %v3702_v0, 0.0  ;;  %v1374_v6 = vand.u32 2147483648, %v3702_v0  ;;  %2134 = vrsqrt.f32 %v3757_v38  ;;  %v4655_v31 = vld [vmem:[#allocation43_spill] sm:$0xff] }
 0x156   : > { %1788 = vst [vmem:[%s3212_s6 + $0x148] sm:$0xff] %v1368_v24  ;;  %v1370_v29 = vmul.f32 %v2127_v45, %v3702_v0  ;;  %vm1378_vm6 = vcmp.eq.f32.partialorder %v3705_v13, inf  ;;  %vm1380_vm7 = vcmp.eq.f32.partialorder %v3705_v13, 0.0  ;;  %2136 = vrsqrt.f32 %v3766_v30  ;;  %v4656_v45 = vld [vmem:[#allocation5_spill] sm:$0xff] }
 0x157   : > { %v2129_v60 = vpop.eup %2128  ;;  %v1381_v50 = vand.u32 2147483648, %v3705_v13  ;;  %vm1385_vm8 = vcmp.eq.f32.partialorder %v3719_v42, inf  ;;  %vm1387_vm9 = vcmp.eq.f32.partialorder %v3719_v42, 0.0  ;;  %v932_v59 = vmul.f32 %v836_v41, %v836_v41 }
 0x158   : > { %v2131_v46 = vpop.eup %2130  ;;  %v1372_v56 = vsel %vm1371_vm4, %v3702_v0, %v1370_v29  ;;  %v1377_v17 = vmul.f32 %v2129_v60, %v3705_v13  ;;  %v933_v3 = vmul.f32 %v837_v23, %v837_v23  ;;  %v3795_v49 = vadd.f32 %v931_v7, %v2942_v47 }
 0x159   : > { %v1375_v40 = vsel %vm1373_vm5, %v1374_v6, %v1372_v56  ;;  %v1384_v19 = vmul.f32 %v2131_v46, %v3719_v42  ;;  %v1388_v2 = vand.u32 2147483648, %v3719_v42  ;;  %v3802_v18 = vadd.f32 %v932_v59, %v2952_v33  ;;  %v4657_v6 = vld [vmem:[#allocation44_spill] sm:$0xff] }
 0x15a   : > { %v1379_v16 = vsel %vm1378_vm6, %v3705_v13, %v1377_v17  ;;  %1789 = vst [vmem:[%s3212_s6 + $0x150] sm:$0xff] %v1375_v40  ;;  %vm1392_vm10 = vcmp.eq.f32.partialorder %v3750_v9, inf  ;;  %v3810_v47 = vadd.f32 %v933_v3, %v2956_v32  ;;  %2138 = vrsqrt.f32 %v3795_v49  ;;  %v706_v13 = vpop.permute.xlu1 %705  ;;  %v710_v40 = vpop.permute.xlu0 %709 }
 0x15b   : > { %v1382_v0 = vsel %vm1380_vm7, %v1381_v50, %v1379_v16  ;;  %v1386_v33 = vsel %vm1385_vm8, %v3719_v42, %v1384_v19  ;;  %vm1394_vm11 = vcmp.eq.f32.partialorder %v3750_v9, 0.0  ;;  %v838_v48 = vsub.f32 %v702_v25, %v2628_v39 }
 0x15c   : > { %v1389_v10 = vsel %vm1387_vm9, %v1388_v2, %v1386_v33  ;;  %1790 = vst [vmem:[%s3212_s6 + $0x158] sm:$0xff] %v1382_v0  ;;  %v1395_v32 = vand.u32 2147483648, %v3750_v9  ;;  %vm1399_vm12 = vcmp.eq.f32.partialorder %v3757_v38, inf  ;;  %2140 = vrsqrt.f32 %v3802_v18 }
 0x15d   : > { %v2133_v26 = vpop.eup %2132  ;;  %1791 = vst [vmem:[%s3212_s6 + $0x160] sm:$0xff] %v1389_v10  ;;  %vm1401_vm13 = vcmp.eq.f32.partialorder %v3757_v38, 0.0  ;;  %v1402_v8 = vand.u32 2147483648, %v3757_v38  ;;  %vm1406_vm14 = vcmp.eq.f32.partialorder %v3766_v30, inf  ;;  %2142 = vrsqrt.f32 %v3810_v47 }
 0x15e   : > { %v1391_v42 = vmul.f32 %v2133_v26, %v3750_v9  ;;  %vm1408_vm15 = vcmp.eq.f32.partialorder %v3766_v30, 0.0  ;;  %v839_v44 = vsub.f32 %v702_v25, %v4605_v27  ;;  %v840_v5 = vsub.f32 %v702_v25, %v4606_v63 }
 0x15f   : > { %v2135_v4 = vpop.eup %2134  ;;  %v1409_v12 = vand.u32 2147483648, %v3766_v30  ;;  %v934_v58 = vmul.f32 %v838_v48, %v838_v48  ;;  %v841_v51 = vsub.f32 %v706_v13, %v2628_v39  ;;  %v842_v21 = vsub.f32 %v706_v13, %v4605_v27 }
 0x160   : > { %v2137_v22 = vpop.eup %2136  ;;  %v1393_v55 = vsel %vm1392_vm10, %v3750_v9, %v1391_v42  ;;  %v1398_v41 = vmul.f32 %v2135_v4, %v3757_v38  ;;  %v935_v61 = vmul.f32 %v839_v44, %v839_v44  ;;  %v936_v62 = vmul.f32 %v840_v5, %v840_v5 }
 0x161   : > { %v1396_v54 = vsel %vm1394_vm11, %v1395_v32, %v1393_v55  ;;  %v1405_v15 = vmul.f32 %v2137_v22, %v3766_v30  ;;  %vm1413_vm0 = vcmp.eq.f32.partialorder %v3795_v49, inf  ;;  %v3847_v23 = vadd.f32 %v934_v58, %v4655_v31 }
 0x162   : > { %v1400_v7 = vsel %vm1399_vm12, %v3757_v38, %v1398_v41  ;;  %1792 = vst [vmem:[%s3212_s6 + $0x168] sm:$0xff] %v1396_v54  ;;  %v3854_v24 = vadd.f32 %v935_v61, %v4656_v45  ;;  %v3857_v9 = vadd.f32 %v936_v62, %v4657_v6  ;;  %v843_v29 = vsub.f32 %v706_v13, %v4606_v63  ;;  %v4658_v54 = vld [vmem:[#allocation6_spill] sm:$0xff] }
 0x163   : > { %v1403_v60 = vsel %vm1401_vm13, %v1402_v8, %v1400_v7  ;;  %v1407_v50 = vsel %vm1406_vm14, %v3766_v30, %v1405_v15  ;;  %2144 = vrsqrt.f32 %v3847_v23  ;;  %v937_v59 = vmul.f32 %v841_v51, %v841_v51 }
 0x164   : > { %v2139_v46 = vpop.eup %2138  ;;  %v1410_v56 = vsel %vm1408_vm15, %v1409_v12, %v1407_v50  ;;  %1793 = vst [vmem:[%s3212_s6 + $0x170] sm:$0xff] %v1403_v60  ;;  %vm1415_vm1 = vcmp.eq.f32.partialorder %v3795_v49, 0.0  ;;  %2146 = vrsqrt.f32 %v3854_v24  ;;  %v938_v17 = vmul.f32 %v842_v21, %v842_v21  ;;  %v4659_v50 = vld [vmem:[#allocation7_spill] sm:$0xff] }
 0x165   : > { %1794 = vst [vmem:[%s3212_s6 + $0x178] sm:$0xff] %v1410_v56  ;;  %v1412_v38 = vmul.f32 %v2139_v46, %v3795_v49  ;;  %v1416_v3 = vand.u32 2147483648, %v3795_v49  ;;  %vm1420_vm2 = vcmp.eq.f32.partialorder %v3802_v18, inf  ;;  %vm1422_vm3 = vcmp.eq.f32.partialorder %v3802_v18, 0.0  ;;  %v4660_v56 = vld [vmem:[#allocation45_spill] sm:$0xff] }
 0x166   : > { %v2141_v25 = vpop.eup %2140  ;;  %v1423_v30 = vand.u32 2147483648, %v3802_v18  ;;  %vm1427_vm4 = vcmp.eq.f32.partialorder %v3810_v47, inf  ;;  %vm1429_vm5 = vcmp.eq.f32.partialorder %v3810_v47, 0.0  ;;  %2148 = vrsqrt.f32 %v3857_v9 }
 0x167   : > { %v2143_v19 = vpop.eup %2142  ;;  %v1414_v2 = vsel %vm1413_vm0, %v3795_v49, %v1412_v38  ;;  %v1419_v16 = vmul.f32 %v2141_v25, %v3802_v18  ;;  %v939_v0 = vmul.f32 %v843_v29, %v843_v29  ;;  %v3885_v33 = vadd.f32 %v937_v59, %v2972_v34 }
 0x168   : > { %v1417_v48 = vsel %vm1415_vm1, %v1416_v3, %v1414_v2  ;;  %v1426_v10 = vmul.f32 %v2143_v19, %v3810_v47  ;;  %v1430_v32 = vand.u32 2147483648, %v3810_v47  ;;  %v3892_v13 = vadd.f32 %v938_v17, %v2976_v37 }
 0x169   : > { %v1421_v26 = vsel %vm1420_vm2, %v3802_v18, %v1419_v16  ;;  %1795 = vst [vmem:[%s3212_s6 + $0x180] sm:$0xff] %v1417_v48  ;;  %v3899_v8 = vadd.f32 %v939_v0, %v2980_v35  ;;  %2150 = vrsqrt.f32 %v3885_v33  ;;  %v844_v34 = vsub.f32 %v710_v40, %v2628_v39  ;;  %v714_v18 = vpop.permute.xlu1 %713 }
 0x16a   : > { %v1424_v49 = vsel %vm1422_vm3, %v1423_v30, %v1421_v26  ;;  %v1428_v37 = vsel %vm1427_vm4, %v3810_v47, %v1426_v10  ;;  %vm1434_vm6 = vcmp.eq.f32.partialorder %v3847_v23, inf  ;;  %vm1436_vm7 = vcmp.eq.f32.partialorder %v3847_v23, 0.0 }
 0x16b   : > { %v1431_v42 = vsel %vm1429_vm5, %v1430_v32, %v1428_v37  ;;  %1796 = vst [vmem:[%s3212_s6 + $0x188] sm:$0xff] %v1424_v49  ;;  %v1437_v35 = vand.u32 2147483648, %v3847_v23  ;;  %vm1441_vm8 = vcmp.eq.f32.partialorder %v3854_v24, inf  ;;  %2152 = vrsqrt.f32 %v3892_v13 }
 0x16c   : > { %1797 = vst [vmem:[%s3212_s6 + $0x190] sm:$0xff] %v1431_v42  ;;  %vm1443_vm9 = vcmp.eq.f32.partialorder %v3854_v24, 0.0  ;;  %v1444_v44 = vand.u32 2147483648, %v3854_v24  ;;  %vm1448_vm10 = vcmp.eq.f32.partialorder %v3857_v9, inf  ;;  %2154 = vrsqrt.f32 %v3899_v8 }
 0x16d   : > { %v2145_v5 = vpop.eup %2144  ;;  %vm1450_vm11 = vcmp.eq.f32.partialorder %v3857_v9, 0.0  ;;  %v845_v47 = vsub.f32 %v710_v40, %v4605_v27  ;;  %v846_v4 = vsub.f32 %v710_v40, %v4606_v63  ;;  %v940_v12 = vmul.f32 %v844_v34, %v844_v34  ;;  %v722_v42 = vpop.permute.xlu1 %721 }
 0x16e   : > { %v2147_v58 = vpop.eup %2146  ;;  %v1433_v51 = vmul.f32 %v2145_v5, %v3847_v23  ;;  %v847_v21 = vsub.f32 %v714_v18, %v2628_v39  ;;  %v848_v22 = vsub.f32 %v714_v18, %v4605_v27  ;;  %v849_v55 = vsub.f32 %v714_v18, %v4606_v63 }
 0x16f   : > { %v1440_v41 = vmul.f32 %v2147_v58, %v3854_v24  ;;  %v941_v61 = vmul.f32 %v845_v47, %v845_v47  ;;  %v942_v62 = vmul.f32 %v846_v4, %v846_v4  ;;  %v3930_v15 = vadd.f32 %v940_v12, %v4658_v54 }
 0x170   : > { %v2149_v31 = vpop.eup %2148  ;;  %v1435_v7 = vsel %vm1434_vm6, %v3847_v23, %v1433_v51  ;;  %v1451_v45 = vand.u32 2147483648, %v3857_v9  ;;  %vm1455_vm12 = vcmp.eq.f32.partialorder %v3885_v33, inf  ;;  %vm1457_vm13 = vcmp.eq.f32.partialorder %v3885_v33, 0.0 }
 0x171   : > { %v1438_v6 = vsel %vm1436_vm7, %v1437_v35, %v1435_v7  ;;  %v1442_v29 = vsel %vm1441_vm8, %v3854_v24, %v1440_v41  ;;  %v1447_v60 = vmul.f32 %v2149_v31, %v3857_v9  ;;  %v3945_v59 = vadd.f32 %v941_v61, %v4659_v50 }
 0x172   : > { %v1445_v46 = vsel %vm1443_vm9, %v1444_v44, %v1442_v29  ;;  %1798 = vst [vmem:[%s3212_s6 + $0x198] sm:$0xff] %v1438_v6  ;;  %v3951_v17 = vadd.f32 %v942_v62, %v4660_v56  ;;  %2156 = vrsqrt.f32 %v3930_v15  ;;  %v943_v23 = vmul.f32 %v847_v21, %v847_v21 }
 0x173   : > { %v2151_v38 = vpop.eup %2150  ;;  %v1449_v3 = vsel %vm1448_vm10, %v3857_v9, %v1447_v60  ;;  %1799 = vst [vmem:[%s3212_s6 + $0x1a0] sm:$0xff] %v1445_v46  ;;  %2158 = vrsqrt.f32 %v3945_v59  ;;  %v944_v25 = vmul.f32 %v848_v22, %v848_v22  ;;  %v945_v30 = vmul.f32 %v849_v55, %v849_v55 }
 0x174   : > { %v1452_v24 = vsel %vm1450_vm11, %v1451_v45, %v1449_v3  ;;  %v1454_v40 = vmul.f32 %v2151_v38, %v3885_v33  ;;  %v1458_v19 = vand.u32 2147483648, %v3885_v33  ;;  %vm1462_vm14 = vcmp.eq.f32.partialorder %v3892_v13, inf }
 0x175   : > { %v2153_v2 = vpop.eup %2152  ;;  %1800 = vst [vmem:[%s3212_s6 + $0x1a8] sm:$0xff] %v1452_v24  ;;  %vm1464_vm15 = vcmp.eq.f32.partialorder %v3892_v13, 0.0  ;;  %v1465_v16 = vand.u32 2147483648, %v3892_v13  ;;  %vm1469_vm0 = vcmp.eq.f32.partialorder %v3899_v8, inf  ;;  %2160 = vrsqrt.f32 %v3951_v17 }
 0x176   : > { %v2155_v0 = vpop.eup %2154  ;;  %v1456_v9 = vsel %vm1455_vm12, %v3885_v33, %v1454_v40  ;;  %v1461_v48 = vmul.f32 %v2153_v2, %v3892_v13  ;;  %vm1471_vm1 = vcmp.eq.f32.partialorder %v3899_v8, 0.0  ;;  %v3975_v10 = vadd.f32 %v943_v23, %v3010_v43 }
 0x177   : > { %v1459_v32 = vsel %vm1457_vm13, %v1458_v19, %v1456_v9  ;;  %v1468_v26 = vmul.f32 %v2155_v0, %v3899_v8  ;;  %v3981_v34 = vadd.f32 %v944_v25, %v3014_v28  ;;  %v3984_v49 = vadd.f32 %v945_v30, %v3018_v53  ;;  %v718_v53 = vpop.permute.xlu0 %717 }
 0x178   : > { %v1463_v37 = vsel %vm1462_vm14, %v3892_v13, %v1461_v48  ;;  %v1472_v43 = vand.u32 2147483648, %v3899_v8  ;;  %1801 = vst [vmem:[%s3212_s6 + $0x1b0] sm:$0xff] %v1459_v32  ;;  %vm1476_vm2 = vcmp.eq.f32.partialorder %v3930_v15, inf  ;;  %2162 = vrsqrt.f32 %v3975_v10  ;;  %v4661_v32 = vld [vmem:[#allocation53_spill] sm:$0xff] }
 0x179   : > { %v1466_v33 = vsel %vm1464_vm15, %v1465_v16, %v1463_v37  ;;  %v1470_v28 = vsel %vm1469_vm0, %v3899_v8, %v1468_v26  ;;  %vm1478_vm3 = vcmp.eq.f32.partialorder %v3930_v15, 0.0  ;;  %2164 = vrsqrt.f32 %v3981_v34  ;;  %v4662_v37 = vld [vmem:[#allocation54_spill] sm:$0xff] }
 0x17a   : > { %v1473_v35 = vsel %vm1471_vm1, %v1472_v43, %v1470_v28  ;;  %1802 = vst [vmem:[%s3212_s6 + $0x1b8] sm:$0xff] %v1466_v33  ;;  %v1479_v18 = vand.u32 2147483648, %v3930_v15  ;;  %vm1483_vm4 = vcmp.eq.f32.partialorder %v3945_v59, inf  ;;  %vm1485_vm5 = vcmp.eq.f32.partialorder %v3945_v59, 0.0  ;;  %v730_v28 = vpop.permute.xlu1 %729 }
 0x17b   : > { %1803 = vst [vmem:[%s3212_s6 + $0x1c0] sm:$0xff] %v1473_v35  ;;  %v1486_v13 = vand.u32 2147483648, %v3945_v59  ;;  %vm1490_vm6 = vcmp.eq.f32.partialorder %v3951_v17, inf  ;;  %vm1492_vm7 = vcmp.eq.f32.partialorder %v3951_v17, 0.0  ;;  %2166 = vrsqrt.f32 %v3984_v49  ;;  %v726_v30 = vpop.permute.xlu0 %725 }
 0x17c   : > { %v2157_v44 = vpop.eup %2156  ;;  %v850_v8 = vsub.f32 %v718_v53, %v2628_v39  ;;  %v851_v5 = vsub.f32 %v718_v53, %v4605_v27  ;;  %v852_v47 = vsub.f32 %v718_v53, %v4606_v63  ;;  %v853_v4 = vsub.f32 %v722_v42, %v2628_v39 }
 0x17d   : > { %v2159_v12 = vpop.eup %2158  ;;  %v1475_v58 = vmul.f32 %v2157_v44, %v3930_v15  ;;  %v1493_v51 = vand.u32 2147483648, %v3951_v17  ;;  %v854_v21 = vsub.f32 %v722_v42, %v4605_v27  ;;  %v855_v22 = vsub.f32 %v722_v42, %v4606_v63 }
 0x17e   : > { %v1482_v55 = vmul.f32 %v2159_v12, %v3945_v59  ;;  %v946_v41 = vmul.f32 %v850_v8, %v850_v8  ;;  %v947_v61 = vmul.f32 %v851_v5, %v851_v5  ;;  %v948_v62 = vmul.f32 %v852_v47, %v852_v47 }
 0x17f   : > { %v2161_v54 = vpop.eup %2160  ;;  %v1477_v31 = vsel %vm1476_vm2, %v3930_v15, %v1475_v58  ;;  %vm1497_vm8 = vcmp.eq.f32.partialorder %v3975_v10, inf  ;;  %vm1499_vm9 = vcmp.eq.f32.partialorder %v3975_v10, 0.0  ;;  %v949_v7 = vmul.f32 %v853_v4, %v853_v4  ;;  %v4663_v58 = vld [vmem:[#allocation50_spill] sm:$0xff] }
 0x180   : > { %v1480_v45 = vsel %vm1478_vm3, %v1479_v18, %v1477_v31  ;;  %v1484_v6 = vsel %vm1483_vm4, %v3945_v59, %v1482_v55  ;;  %v1489_v29 = vmul.f32 %v2161_v54, %v3951_v17  ;;  %v4032_v60 = vadd.f32 %v946_v41, %v2994_v11  ;;  %v4665_v31 = vld [vmem:[#allocation52_spill] sm:$0xff] }
 0x181   : > { %v1487_v50 = vsel %vm1485_vm5, %v1486_v13, %v1484_v6  ;;  %1804 = vst [vmem:[%s3212_s6 + $0x1c8] sm:$0xff] %v1480_v45  ;;  %v1500_v46 = vand.u32 2147483648, %v3975_v10  ;;  %v4039_v56 = vadd.f32 %v947_v61, %v2998_v20  ;;  %v4042_v15 = vadd.f32 %v948_v62, %v3006_v36  ;;  %v4664_v62 = vld [vmem:[#allocation51_spill] sm:$0xff] }
 0x182   : > { %v2163_v23 = vpop.eup %2162  ;;  %v1491_v38 = vsel %vm1490_vm6, %v3951_v17, %v1489_v29  ;;  %1805 = vst [vmem:[%s3212_s6 + $0x1d0] sm:$0xff] %v1487_v50  ;;  %2168 = vrsqrt.f32 %v4032_v60  ;;  %v950_v11 = vmul.f32 %v854_v21, %v854_v21  ;;  %v951_v59 = vmul.f32 %v855_v22, %v855_v22 }
 0x183   : > { %v2165_v3 = vpop.eup %2164  ;;  %v1494_v25 = vsel %vm1492_vm7, %v1493_v51, %v1491_v38  ;;  %v1496_v20 = vmul.f32 %v2163_v23, %v3975_v10  ;;  %2170 = vrsqrt.f32 %v4039_v56  ;;  %v4054_v36 = vadd.f32 %v949_v7, %v3034_v57 }
 0x184   : > { %1806 = vst [vmem:[%s3212_s6 + $0x1d8] sm:$0xff] %v1494_v25  ;;  %v1503_v24 = vmul.f32 %v2165_v3, %v3981_v34  ;;  %vm1504_vm10 = vcmp.eq.f32.partialorder %v3981_v34, inf  ;;  %vm1506_vm11 = vcmp.eq.f32.partialorder %v3981_v34, 0.0  ;;  %v1507_v40 = vand.u32 2147483648, %v3981_v34 }
 0x185   : > { %v2167_v17 = vpop.eup %2166  ;;  %v1498_v19 = vsel %vm1497_vm8, %v3975_v10, %v1496_v20  ;;  %vm1511_vm12 = vcmp.eq.f32.partialorder %v3984_v49, inf  ;;  %v1514_v57 = vand.u32 2147483648, %v3984_v49  ;;  %2172 = vrsqrt.f32 %v4042_v15  ;;  %v734_v20 = vpop.permute.xlu0 %733 }
 0x186   : > { %v1501_v2 = vsel %vm1499_vm9, %v1500_v46, %v1498_v19  ;;  %v1505_v16 = vsel %vm1504_vm10, %v3981_v34, %v1503_v24  ;;  %v1510_v0 = vmul.f32 %v2167_v17, %v3984_v49  ;;  %v856_v9 = vsub.f32 %v726_v30, %v2628_v39 }
 0x187   : > { %v1508_v48 = vsel %vm1506_vm11, %v1507_v40, %v1505_v16  ;;  %1807 = vst [vmem:[%s3212_s6 + $0x1e0] sm:$0xff] %v1501_v2  ;;  %v4074_v26 = vadd.f32 %v950_v11, %v4661_v32  ;;  %v4077_v43 = vadd.f32 %v951_v59, %v4662_v37  ;;  %2174 = vrsqrt.f32 %v4054_v36  ;;  %v4666_v32 = vld [vmem:[#allocation49_spill] sm:$0xff] }
 0x188   : > { %v1512_v10 = vsel %vm1511_vm12, %v3984_v49, %v1510_v0  ;;  %vm1513_vm13 = vcmp.eq.f32.partialorder %v3984_v49, 0.0  ;;  %1808 = vst [vmem:[%s3212_s6 + $0x1e8] sm:$0xff] %v1508_v48  ;;  %vm1518_vm14 = vcmp.eq.f32.partialorder %v4032_v60, inf  ;;  %vm1520_vm15 = vcmp.eq.f32.partialorder %v4032_v60, 0.0 }
 0x189   : > { %v1515_v34 = vsel %vm1513_vm13, %v1514_v57, %v1512_v10  ;;  %v1521_v33 = vand.u32 2147483648, %v4032_v60  ;;  %vm1525_vm0 = vcmp.eq.f32.partialorder %v4039_v56, inf  ;;  %2176 = vrsqrt.f32 %v4074_v26 }
 0x18a   : > { %1809 = vst [vmem:[%s3212_s6 + $0x1f0] sm:$0xff] %v1515_v34  ;;  %vm1527_vm1 = vcmp.eq.f32.partialorder %v4039_v56, 0.0  ;;  %v1528_v53 = vand.u32 2147483648, %v4039_v56  ;;  %vm1532_vm2 = vcmp.eq.f32.partialorder %v4042_v15, inf  ;;  %2178 = vrsqrt.f32 %v4077_v43 }
 0x18b   : > { %vm1534_vm3 = vcmp.eq.f32.partialorder %v4042_v15, 0.0  ;;  %v857_v49 = vsub.f32 %v726_v30, %v4605_v27  ;;  %v858_v42 = vsub.f32 %v726_v30, %v4606_v63  ;;  %v952_v35 = vmul.f32 %v856_v9, %v856_v9 }
 0x18c   : > { %v2169_v18 = vpop.eup %2168  ;;  %v1535_v13 = vand.u32 2147483648, %v4042_v15  ;;  %vm1539_vm4 = vcmp.eq.f32.partialorder %v4054_v36, inf  ;;  %v859_v44 = vsub.f32 %v730_v28, %v2628_v39  ;;  %v860_v8 = vsub.f32 %v730_v28, %v4605_v27 }
 0x18d   : > { %v2171_v5 = vpop.eup %2170  ;;  %v1517_v47 = vmul.f32 %v2169_v18, %v4032_v60  ;;  %v953_v4 = vmul.f32 %v857_v49, %v857_v49  ;;  %v954_v12 = vmul.f32 %v858_v42, %v858_v42  ;;  %v4102_v51 = vadd.f32 %v952_v35, %v4663_v58 }
 0x18e   : > { %v1524_v21 = vmul.f32 %v2171_v5, %v4039_v56  ;;  %vm1541_vm5 = vcmp.eq.f32.partialorder %v4054_v36, 0.0  ;;  %v1542_v22 = vand.u32 2147483648, %v4054_v36  ;;  %v861_v55 = vsub.f32 %v730_v28, %v4606_v63 }
 0x18f   : > { %v2173_v41 = vpop.eup %2172  ;;  %v1519_v61 = vsel %vm1518_vm14, %v4032_v60, %v1517_v47  ;;  %v4112_v54 = vadd.f32 %v953_v4, %v4664_v62  ;;  %v4115_v7 = vadd.f32 %v954_v12, %v4665_v31  ;;  %2180 = vrsqrt.f32 %v4102_v51  ;;  %v4667_v47 = vld [vmem:[#allocation55_spill] sm:$0xff]  ;;  %v4668_v12 = vld [vmem:[#allocation56_spill] sm:$0xff] }
 0x190   : > { %v1522_v45 = vsel %vm1520_vm15, %v1521_v33, %v1519_v61  ;;  %v1526_v6 = vsel %vm1525_vm0, %v4039_v56, %v1524_v21  ;;  %v1531_v29 = vmul.f32 %v2173_v41, %v4042_v15  ;;  %vm1546_vm6 = vcmp.eq.f32.partialorder %v4074_v26, inf  ;;  %v4669_v21 = vld [vmem:[#allocation8_spill] sm:$0xff] }
 0x191   : > { %v2175_v50 = vpop.eup %2174  ;;  %v1529_v46 = vsel %vm1527_vm1, %v1528_v53, %v1526_v6  ;;  %1810 = vst [vmem:[%s3212_s6 + $0x1f8] sm:$0xff] %v1522_v45  ;;  %2182 = vrsqrt.f32 %v4112_v54  ;;  %v955_v23 = vmul.f32 %v859_v44, %v859_v44  ;;  %v956_v38 = vmul.f32 %v860_v8, %v860_v8 }
 0x192   : > { %v1533_v60 = vsel %vm1532_vm2, %v4042_v15, %v1531_v29  ;;  %1811 = vst [vmem:[%s3212_s6 + $0x200] sm:$0xff] %v1529_v46  ;;  %v1538_v11 = vmul.f32 %v2175_v50, %v4054_v36  ;;  %vm1548_vm7 = vcmp.eq.f32.partialorder %v4074_v26, 0.0  ;;  %v957_v59 = vmul.f32 %v861_v55, %v861_v55  ;;  %v742_v46 = vpop.permute.xlu0 %741 }
 0x193   : > { %v2177_v3 = vpop.eup %2176  ;;  %v1536_v56 = vsel %vm1534_vm3, %v1535_v13, %v1533_v60  ;;  %v1549_v25 = vand.u32 2147483648, %v4074_v26  ;;  %vm1553_vm8 = vcmp.eq.f32.partialorder %v4077_v43, inf  ;;  %2184 = vrsqrt.f32 %v4115_v7 }
 0x194   : > { %v2179_v30 = vpop.eup %2178  ;;  %1812 = vst [vmem:[%s3212_s6 + $0x208] sm:$0xff] %v1536_v56  ;;  %v1540_v24 = vsel %vm1539_vm4, %v4054_v36, %v1538_v11  ;;  %v1545_v40 = vmul.f32 %v2177_v3, %v4074_v26  ;;  %vm1555_vm9 = vcmp.eq.f32.partialorder %v4077_v43, 0.0  ;;  %v1556_v15 = vand.u32 2147483648, %v4077_v43  ;;  %v4670_v3 = vld [vmem:[#allocation59_spill] sm:$0xff] }
 0x195   : > { %v1543_v17 = vsel %vm1541_vm5, %v1542_v22, %v1540_v24  ;;  %v1552_v19 = vmul.f32 %v2179_v30, %v4077_v43  ;;  %v4151_v57 = vadd.f32 %v955_v23, %v3062_v14  ;;  %v4154_v2 = vadd.f32 %v956_v38, %v3068_v1 }
 0x196   : > { %v1547_v16 = vsel %vm1546_vm6, %v4074_v26, %v1545_v40  ;;  %1813 = vst [vmem:[%s3212_s6 + $0x210] sm:$0xff] %v1543_v17  ;;  %v4161_v0 = vadd.f32 %v957_v59, %v3072_v52  ;;  %v862_v36 = vsub.f32 %v734_v20, %v2628_v39  ;;  %v863_v9 = vsub.f32 %v734_v20, %v4605_v27  ;;  %v738_v26 = vpop.permute.xlu1 %737 }
 0x197   : > { %v1550_v14 = vsel %vm1548_vm7, %v1549_v25, %v1547_v16  ;;  %v1554_v1 = vsel %vm1553_vm8, %v4077_v43, %v1552_v19  ;;  %2186 = vrsqrt.f32 %v4151_v57  ;;  %v864_v48 = vsub.f32 %v734_v20, %v4606_v63  ;;  %v4671_v25 = vld [vmem:[#allocation13_spill] sm:$0xff]  ;;  %v4672_v16 = vld [vmem:[#allocation60_spill] sm:$0xff] }
 0x198   : > { %v4174_v37 = vmul.f32 %v4666_v32, %v4666_v32  ;;  %v1557_v52 = vsel %vm1555_vm9, %v1556_v15, %v1554_v1  ;;  %1814 = vst [vmem:[%s3212_s6 + $0x218] sm:$0xff] %v1550_v14  ;;  %vm1560_vm10 = vcmp.eq.f32.partialorder %v4102_v51, inf  ;;  %2188 = vrsqrt.f32 %v4154_v2 }
 0x199   : > { %v2181_v10 = vpop.eup %2180  ;;  %1815 = vst [vmem:[%s3212_s6 + $0x220] sm:$0xff] %v1557_v52  ;;  %vm1562_vm11 = vcmp.eq.f32.partialorder %v4102_v51, 0.0  ;;  %v1563_v34 = vand.u32 2147483648, %v4102_v51  ;;  %vm1567_vm12 = vcmp.eq.f32.partialorder %v4112_v54, inf  ;;  %2190 = vrsqrt.f32 %v4161_v0 }
 0x19a   : > { %v1559_v33 = vmul.f32 %v2181_v10, %v4102_v51  ;;  %vm1569_vm13 = vcmp.eq.f32.partialorder %v4112_v54, 0.0  ;;  %v1570_v43 = vand.u32 2147483648, %v4112_v54  ;;  %vm1574_vm14 = vcmp.eq.f32.partialorder %v4115_v7, inf }
 0x19b   : > { %v2183_v28 = vpop.eup %2182  ;;  %v958_v53 = vmul.f32 %v862_v36, %v862_v36  ;;  %v959_v49 = vmul.f32 %v863_v9, %v863_v9  ;;  %v960_v42 = vmul.f32 %v864_v48, %v864_v48  ;;  %v865_v35 = vsub.f32 %v738_v26, %v2628_v39  ;;  %v746_v48 = vpop.permute.xlu1 %745 }
 0x19c   : > { %v1561_v18 = vsel %vm1560_vm10, %v4102_v51, %v1559_v33  ;;  %v1566_v13 = vmul.f32 %v2183_v28, %v4112_v54  ;;  %vm1576_vm15 = vcmp.eq.f32.partialorder %v4115_v7, 0.0  ;;  %v866_v44 = vsub.f32 %v738_v26, %v4605_v27 }
 0x19d   : > { %v2185_v8 = vpop.eup %2184  ;;  %v1564_v5 = vsel %vm1562_vm11, %v1563_v34, %v1561_v18  ;;  %v4200_v4 = vadd.f32 %v958_v53, %v4667_v47  ;;  %v4203_v58 = vadd.f32 %v959_v49, %v4668_v12  ;;  %v4206_v22 = vadd.f32 %v960_v42, %v4669_v21 }
 0x19e   : > { %v1568_v55 = vsel %vm1567_vm12, %v4112_v54, %v1566_v13  ;;  %v1573_v41 = vmul.f32 %v2185_v8, %v4115_v7  ;;  %v1577_v61 = vand.u32 2147483648, %v4115_v7  ;;  %1816 = vst [vmem:[%s3212_s6 + $0x228] sm:$0xff] %v1564_v5  ;;  %v867_v51 = vsub.f32 %v738_v26, %v4606_v63  ;;  %v4674_v8 = vld [vmem:[#allocation57_spill] sm:$0xff] }
 0x19f   : > { %v1571_v62 = vsel %vm1569_vm13, %v1570_v43, %v1568_v55  ;;  %2192 = vrsqrt.f32 %v4200_v4  ;;  %v961_v31 = vmul.f32 %v865_v35, %v865_v35  ;;  %v962_v45 = vmul.f32 %v866_v44, %v866_v44  ;;  %v4673_v35 = vld [vmem:[#allocation9_spill] sm:$0xff]  ;;  %v4675_v55 = vld [vmem:[#allocation58_spill] sm:$0xff] }
 0x1a0   : > { %v1575_v6 = vsel %vm1574_vm14, %v4115_v7, %v1573_v41  ;;  %1817 = vst [vmem:[%s3212_s6 + $0x230] sm:$0xff] %v1571_v62  ;;  %vm1581_vm0 = vcmp.eq.f32.partialorder %v4151_v57, inf  ;;  %vm1583_vm1 = vcmp.eq.f32.partialorder %v4151_v57, 0.0  ;;  %2194 = vrsqrt.f32 %v4203_v58 }
 0x1a1   : > { %v2187_v29 = vpop.eup %2186  ;;  %v1578_v54 = vsel %vm1576_vm15, %v1577_v61, %v1575_v6  ;;  %v1584_v50 = vand.u32 2147483648, %v4151_v57  ;;  %vm1588_vm2 = vcmp.eq.f32.partialorder %v4154_v2, inf  ;;  %2196 = vrsqrt.f32 %v4206_v22 }
 0x1a2   : > { %v2189_v23 = vpop.eup %2188  ;;  %1818 = vst [vmem:[%s3212_s6 + $0x238] sm:$0xff] %v1578_v54  ;;  %v1580_v38 = vmul.f32 %v2187_v29, %v4151_v57  ;;  %vm1590_vm3 = vcmp.eq.f32.partialorder %v4154_v2, 0.0  ;;  %v1591_v60 = vand.u32 2147483648, %v4154_v2  ;;  %vm1595_vm4 = vcmp.eq.f32.partialorder %v4161_v0, inf }
 0x1a3   : > { %v2191_v11 = vpop.eup %2190  ;;  %v1587_v7 = vmul.f32 %v2189_v23, %v4154_v2  ;;  %v963_v59 = vmul.f32 %v867_v51, %v867_v51  ;;  %v4237_v56 = vadd.f32 %v961_v31, %v4670_v3  ;;  %v4240_v20 = vadd.f32 %v962_v45, %v4671_v25  ;;  %v4677_v25 = vld [vmem:[#allocation64_spill] sm:$0xff] }
 0x1a4   : > { %v1582_v30 = vsel %vm1581_vm0, %v4151_v57, %v1580_v38  ;;  %v1594_v24 = vmul.f32 %v2191_v11, %v4161_v0  ;;  %v1598_v40 = vand.u32 2147483648, %v4161_v0  ;;  %v868_v15 = vsub.f32 %v742_v46, %v2628_v39 }
 0x1a5   : > { %v1585_v17 = vsel %vm1583_vm1, %v1584_v50, %v1582_v30  ;;  %v1589_v19 = vsel %vm1588_vm2, %v4154_v2, %v1587_v7  ;;  %v4254_v36 = vadd.f32 %v963_v59, %v4672_v16  ;;  %2198 = vrsqrt.f32 %v4237_v56  ;;  %v750_v7 = vpop.permute.xlu0 %749 }
 0x1a6   : > { %v1592_v9 = vsel %vm1590_vm3, %v1591_v60, %v1589_v19  ;;  %v1596_v14 = vsel %vm1595_vm4, %v4161_v0, %v1594_v24  ;;  %vm1597_vm5 = vcmp.eq.f32.partialorder %v4161_v0, 0.0  ;;  %1819 = vst [vmem:[%s3212_s6 + $0x240] sm:$0xff] %v1585_v17  ;;  %v869_v57 = vsub.f32 %v742_v46, %v4605_v27  ;;  %v4676_v60 = vld [vmem:[#allocation63_spill] sm:$0xff] }
 0x1a7   : > { %v1599_v1 = vsel %vm1597_vm5, %v1598_v40, %v1596_v14  ;;  %1820 = vst [vmem:[%s3212_s6 + $0x248] sm:$0xff] %v1592_v9  ;;  %vm1602_vm6 = vcmp.eq.f32.partialorder %v4200_v4, inf  ;;  %vm1604_vm7 = vcmp.eq.f32.partialorder %v4200_v4, 0.0  ;;  %2200 = vrsqrt.f32 %v4240_v20 }
 0x1a8   : > { %1821 = vst [vmem:[%s3212_s6 + $0x250] sm:$0xff] %v1599_v1  ;;  %v1605_v2 = vand.u32 2147483648, %v4200_v4  ;;  %vm1609_vm8 = vcmp.eq.f32.partialorder %v4203_v58, inf  ;;  %vm1611_vm9 = vcmp.eq.f32.partialorder %v4203_v58, 0.0  ;;  %2202 = vrsqrt.f32 %v4254_v36 }
 0x1a9   : > { %v2193_v0 = vpop.eup %2192  ;;  %v1612_v32 = vand.u32 2147483648, %v4203_v58  ;;  %vm1616_vm10 = vcmp.eq.f32.partialorder %v4206_v22, inf  ;;  %v870_v52 = vsub.f32 %v742_v46, %v4606_v63  ;;  %v964_v26 = vmul.f32 %v868_v15, %v868_v15  ;;  %v4678_v15 = vld [vmem:[#allocation65_spill] sm:$0xff] }
 0x1aa   : > { %v2195_v10 = vpop.eup %2194  ;;  %v1601_v34 = vmul.f32 %v2193_v0, %v4200_v4  ;;  %vm1618_vm11 = vcmp.eq.f32.partialorder %v4206_v22, 0.0  ;;  %v965_v33 = vmul.f32 %v869_v57, %v869_v57  ;;  %v871_v43 = vsub.f32 %v746_v48, %v2628_v39  ;;  %v754_v57 = vpop.permute.xlu1 %753 }
 0x1ab   : > { %v2197_v28 = vpop.eup %2196  ;;  %v1608_v53 = vmul.f32 %v2195_v10, %v4203_v58  ;;  %v1619_v49 = vand.u32 2147483648, %v4206_v22  ;;  %v966_v42 = vmul.f32 %v870_v52, %v870_v52  ;;  %v4281_v18 = vadd.f32 %v964_v26, %v4673_v35  ;;  %v4679_v35 = vld [vmem:[#allocation14_spill] sm:$0xff] }
 0x1ac   : > { %v1603_v13 = vsel %vm1602_vm6, %v4200_v4, %v1601_v34  ;;  %v1615_v44 = vmul.f32 %v2197_v28, %v4206_v22  ;;  %v4288_v5 = vadd.f32 %v965_v33, %v4674_v8  ;;  %v872_v47 = vsub.f32 %v746_v48, %v4605_v27  ;;  %v4680_v8 = vld [vmem:[#allocation61_spill] sm:$0xff] }
 0x1ad   : > { %v1606_v12 = vsel %vm1604_vm7, %v1605_v2, %v1603_v13  ;;  %v1610_v21 = vsel %vm1609_vm8, %v4203_v58, %v1608_v53  ;;  %v4297_v41 = vadd.f32 %v966_v42, %v4675_v55  ;;  %2204 = vrsqrt.f32 %v4281_v18 }
 0x1ae   : > { %v1613_v61 = vsel %vm1611_vm9, %v1612_v32, %v1610_v21  ;;  %v1617_v51 = vsel %vm1616_vm10, %v4206_v22, %v1615_v44  ;;  %1822 = vst [vmem:[%s3212_s6 + $0x258] sm:$0xff] %v1606_v12  ;;  %v873_v4 = vsub.f32 %v746_v48, %v4606_v63  ;;  %v967_v62 = vmul.f32 %v871_v43, %v871_v43  ;;  %v4681_v12 = vld [vmem:[#allocation62_spill] sm:$0xff] }
 0x1af   : > { %v2199_v31 = vpop.eup %2198  ;;  %v1620_v45 = vsel %vm1618_vm11, %v1619_v49, %v1617_v51  ;;  %1823 = vst [vmem:[%s3212_s6 + $0x260] sm:$0xff] %v1613_v61  ;;  %vm1623_vm12 = vcmp.eq.f32.partialorder %v4237_v56, inf  ;;  %vm1625_vm13 = vcmp.eq.f32.partialorder %v4237_v56, 0.0  ;;  %2206 = vrsqrt.f32 %v4288_v5 }
 0x1b0   : > { %1824 = vst [vmem:[%s3212_s6 + $0x268] sm:$0xff] %v1620_v45  ;;  %v1622_v58 = vmul.f32 %v2199_v31, %v4237_v56  ;;  %v1626_v6 = vand.u32 2147483648, %v4237_v56  ;;  %vm1630_vm14 = vcmp.eq.f32.partialorder %v4240_v20, inf  ;;  %2208 = vrsqrt.f32 %v4297_v41 }
 0x1b1   : > { %v2201_v29 = vpop.eup %2200  ;;  %vm1632_vm15 = vcmp.eq.f32.partialorder %v4240_v20, 0.0  ;;  %v1633_v22 = vand.u32 2147483648, %v4240_v20  ;;  %vm1637_vm0 = vcmp.eq.f32.partialorder %v4254_v36, inf  ;;  %v968_v54 = vmul.f32 %v872_v47, %v872_v47 }
 0x1b2   : > { %v2203_v50 = vpop.eup %2202  ;;  %v1624_v46 = vsel %vm1623_vm12, %v4237_v56, %v1622_v58  ;;  %v1629_v23 = vmul.f32 %v2201_v29, %v4240_v20  ;;  %v969_v38 = vmul.f32 %v873_v4, %v873_v4  ;;  %v4324_v11 = vadd.f32 %v967_v62, %v4676_v60 }
 0x1b3   : > { %v1627_v59 = vsel %vm1625_vm13, %v1626_v6, %v1624_v46  ;;  %v1636_v3 = vmul.f32 %v2203_v50, %v4254_v36  ;;  %vm1639_vm1 = vcmp.eq.f32.partialorder %v4254_v36, 0.0  ;;  %v4331_v30 = vadd.f32 %v968_v54, %v4677_v25  ;;  %v758_v6 = vpop.permute.xlu0 %757  ;;  %v4682_v46 = vld [vmem:[#allocation66_spill] sm:$0xff] }
 0x1b4   : > { %v1631_v24 = vsel %vm1630_vm14, %v4240_v20, %v1629_v23  ;;  %v1640_v40 = vand.u32 2147483648, %v4254_v36  ;;  %1825 = vst [vmem:[%s3212_s6 + $0x270] sm:$0xff] %v1627_v59  ;;  %v4339_v17 = vadd.f32 %v969_v38, %v4678_v15  ;;  %2210 = vrsqrt.f32 %v4324_v11  ;;  %v4683_v59 = vld [vmem:[#allocation67_spill] sm:$0xff] }
 0x1b5   : > { %v1634_v56 = vsel %vm1632_vm15, %v1633_v22, %v1631_v24  ;;  %v1638_v19 = vsel %vm1637_vm0, %v4254_v36, %v1636_v3  ;;  %vm1644_vm2 = vcmp.eq.f32.partialorder %v4281_v18, inf  ;;  %v874_v16 = vsub.f32 %v750_v7, %v2628_v39 }
 0x1b6   : > { %v1641_v9 = vsel %vm1639_vm1, %v1640_v40, %v1638_v19  ;;  %1826 = vst [vmem:[%s3212_s6 + $0x278] sm:$0xff] %v1634_v56  ;;  %vm1646_vm3 = vcmp.eq.f32.partialorder %v4281_v18, 0.0  ;;  %v1647_v14 = vand.u32 2147483648, %v4281_v18  ;;  %2212 = vrsqrt.f32 %v4331_v30  ;;  %v4684_v19 = vld [vmem:[#allocation46_spill] sm:$0xff] }
 0x1b7   : > { %v2205_v1 = vpop.eup %2204  ;;  %1827 = vst [vmem:[%s3212_s6 + $0x280] sm:$0xff] %v1641_v9  ;;  %vm1651_vm4 = vcmp.eq.f32.partialorder %v4288_v5, inf  ;;  %vm1653_vm5 = vcmp.eq.f32.partialorder %v4288_v5, 0.0  ;;  %v1654_v20 = vand.u32 2147483648, %v4288_v5  ;;  %2214 = vrsqrt.f32 %v4339_v17 }
 0x1b8   : > { %v1643_v36 = vmul.f32 %v2205_v1, %v4281_v18  ;;  %vm1658_vm6 = vcmp.eq.f32.partialorder %v4297_v41, inf  ;;  %v875_v48 = vsub.f32 %v750_v7, %v4605_v27  ;;  %v876_v2 = vsub.f32 %v750_v7, %v4606_v63 }
 0x1b9   : > { %v2207_v0 = vpop.eup %2206  ;;  %vm1660_vm7 = vcmp.eq.f32.partialorder %v4297_v41, 0.0  ;;  %v970_v32 = vmul.f32 %v874_v16, %v874_v16  ;;  %v877_v52 = vsub.f32 %v754_v57, %v2628_v39  ;;  %v878_v26 = vsub.f32 %v754_v57, %v4605_v27  ;;  %v4685_v16 = vld [vmem:[#allocation47_spill] sm:$0xff] }
 0x1ba   : > { %v2209_v10 = vpop.eup %2208  ;;  %v1645_v34 = vsel %vm1644_vm2, %v4281_v18, %v1643_v36  ;;  %v1650_v33 = vmul.f32 %v2207_v0, %v4288_v5  ;;  %v971_v43 = vmul.f32 %v875_v48, %v875_v48  ;;  %v972_v28 = vmul.f32 %v876_v2, %v876_v2 }
 0x1bb   : > { %v1648_v53 = vsel %vm1646_vm3, %v1647_v14, %v1645_v34  ;;  %v1657_v49 = vmul.f32 %v2209_v10, %v4297_v41  ;;  %v1661_v42 = vand.u32 2147483648, %v4297_v41  ;;  %v4374_v13 = vadd.f32 %v970_v32, %v4679_v35 }
 0x1bc   : > { %v1652_v44 = vsel %vm1651_vm4, %v4288_v5, %v1650_v33  ;;  %1828 = vst [vmem:[%s3212_s6 + $0x288] sm:$0xff] %v1648_v53  ;;  %v4381_v47 = vadd.f32 %v971_v43, %v4680_v8  ;;  %v4384_v18 = vadd.f32 %v972_v28, %v4681_v12  ;;  %v879_v21 = vsub.f32 %v754_v57, %v4606_v63 }
 0x1bd   : > { %v1655_v55 = vsel %vm1653_vm5, %v1654_v20, %v1652_v44  ;;  %v1659_v61 = vsel %vm1658_vm6, %v4297_v41, %v1657_v49  ;;  %2216 = vrsqrt.f32 %v4374_v13  ;;  %v973_v51 = vmul.f32 %v877_v52, %v877_v52 }
 0x1be   : > { %v2211_v4 = vpop.eup %2210  ;;  %v1662_v62 = vsel %vm1660_vm7, %v1661_v42, %v1659_v61  ;;  %1829 = vst [vmem:[%s3212_s6 + $0x290] sm:$0xff] %v1655_v55  ;;  %vm1665_vm8 = vcmp.eq.f32.partialorder %v4324_v11, inf  ;;  %2218 = vrsqrt.f32 %v4381_v47  ;;  %v974_v31 = vmul.f32 %v878_v26, %v878_v26 }
 0x1bf   : > { %1830 = vst [vmem:[%s3212_s6 + $0x298] sm:$0xff] %v1662_v62  ;;  %v1664_v5 = vmul.f32 %v2211_v4, %v4324_v11  ;;  %vm1667_vm9 = vcmp.eq.f32.partialorder %v4324_v11, 0.0  ;;  %v1668_v45 = vand.u32 2147483648, %v4324_v11  ;;  %vm1672_vm10 = vcmp.eq.f32.partialorder %v4331_v30, inf }
 0x1c0   : > { %v2213_v58 = vpop.eup %2212  ;;  %vm1674_vm11 = vcmp.eq.f32.partialorder %v4331_v30, 0.0  ;;  %v1675_v41 = vand.u32 2147483648, %v4331_v30  ;;  %vm1679_vm12 = vcmp.eq.f32.partialorder %v4339_v17, inf  ;;  %2220 = vrsqrt.f32 %v4384_v18 }
 0x1c1   : > { %v2215_v29 = vpop.eup %2214  ;;  %v1666_v22 = vsel %vm1665_vm8, %v4324_v11, %v1664_v5  ;;  %v1671_v54 = vmul.f32 %v2213_v58, %v4331_v30  ;;  %v975_v50 = vmul.f32 %v879_v21, %v879_v21  ;;  %v4410_v23 = vadd.f32 %v973_v51, %v4682_v46 }
 0x1c2   : > { %v1669_v38 = vsel %vm1667_vm9, %v1668_v45, %v1666_v22  ;;  %v1678_v60 = vmul.f32 %v2215_v29, %v4339_v17  ;;  %v1682_v7 = vand.u32 2147483648, %v4339_v17  ;;  %v4415_v3 = vadd.f32 %v974_v31, %v4683_v59 }
 0x1c3   : > { %v1673_v11 = vsel %vm1672_vm10, %v4331_v30, %v1671_v54  ;;  %1831 = vst [vmem:[%s3212_s6 + $0x2a0] sm:$0xff] %v1669_v38  ;;  %v4422_v25 = vadd.f32 %v975_v50, %v4174_v37  ;;  %2222 = vrsqrt.f32 %v4410_v23  ;;  %v880_v24 = vsub.f32 %v758_v6, %v2628_v39  ;;  %v4686_v39 = vld [vmem:[#allocation48_spill] sm:$0xff] }
 0x1c4   : > { %v1676_v40 = vsel %vm1674_vm11, %v1675_v41, %v1673_v11  ;;  %v1680_v15 = vsel %vm1679_vm12, %v4339_v17, %v1678_v60  ;;  %vm1681_vm13 = vcmp.eq.f32.partialorder %v4339_v17, 0.0  ;;  %2224 = vrsqrt.f32 %v4415_v3 }
 0x1c5   : > { %v1683_v56 = vsel %vm1681_vm13, %v1682_v7, %v1680_v15  ;;  %1832 = vst [vmem:[%s3212_s6 + $0x2a8] sm:$0xff] %v1676_v40  ;;  %v629_v37 = vmul.f32 %v4684_v19, %v4684_v19  ;;  %v630_v9 = vmul.f32 %v4685_v16, %v4685_v16  ;;  %v631_v30 = vmul.f32 %v4686_v39, %v4686_v39 }
 0x1c6   : > { %1833 = vst [vmem:[%s3212_s6 + $0x2b0] sm:$0xff] %v1683_v56  ;;  %2226 = vrsqrt.f32 %v4422_v25  ;;  %vm1686_vm14 = vcmp.eq.f32.partialorder %v4374_v13, inf  ;;  %v881_v17 = vsub.f32 %v758_v6, %v4605_v27  ;;  %v882_v57 = vsub.f32 %v758_v6, %v4606_v63 }
 0x1c7   : > { %v2217_v14 = vpop.eup %2216  ;;  %v976_v1 = vmul.f32 %v880_v24, %v880_v24  ;;  %vm1688_vm15 = vcmp.eq.f32.partialorder %v4374_v13, 0.0  ;;  %v1689_v48 = vand.u32 2147483648, %v4374_v13  ;;  %vm1693_vm0 = vcmp.eq.f32.partialorder %v4381_v47, inf }
 0x1c8   : > { %v2219_v20 = vpop.eup %2218  ;;  %v1685_v36 = vmul.f32 %v2217_v14, %v4374_v13  ;;  %v977_v0 = vmul.f32 %v881_v17, %v881_v17  ;;  %v978_v32 = vmul.f32 %v882_v57, %v882_v57  ;;  %vm1695_vm1 = vcmp.eq.f32.partialorder %v4381_v47, 0.0 }
 0x1c9   : > { %v1692_v2 = vmul.f32 %v2219_v20, %v4381_v47  ;;  %v1072_v52 = vadd.f32 %v976_v1, %v629_v37  ;;  %v1696_v63 = vand.u32 2147483648, %v4381_v47  ;;  %vm1700_vm2 = vcmp.eq.f32.partialorder %v4384_v18, inf }
 0x1ca   : > { %v2221_v26 = vpop.eup %2220  ;;  %v1687_v27 = vsel %vm1686_vm14, %v4374_v13, %v1685_v36  ;;  %v1073_v43 = vadd.f32 %v977_v0, %v630_v9  ;;  %v1703_v53 = vand.u32 2147483648, %v4384_v18  ;;  %v1074_v49 = vadd.f32 %v978_v32, %v631_v30 }
 0x1cb   : > { %v1690_v10 = vsel %vm1688_vm15, %v1689_v48, %v1687_v27  ;;  %v1694_v34 = vsel %vm1693_vm0, %v4381_v47, %v1692_v2  ;;  %v1699_v33 = vmul.f32 %v2221_v26, %v4384_v18  ;;  %2228 = vrsqrt.f32 %v1072_v52 }
 0x1cc   : > { %v1697_v28 = vsel %vm1695_vm1, %v1696_v63, %v1694_v34  ;;  %1834 = vst [vmem:[%s3212_s6 + $0x2b8] sm:$0xff] %v1690_v10  ;;  %vm1702_vm3 = vcmp.eq.f32.partialorder %v4384_v18, 0.0  ;;  %2230 = vrsqrt.f32 %v1073_v43  ;;  %vm1707_vm4 = vcmp.eq.f32.partialorder %v4410_v23, inf }
 0x1cd   : > { %v2223_v42 = vpop.eup %2222  ;;  %v1701_v35 = vsel %vm1700_vm2, %v4384_v18, %v1699_v33  ;;  %1835 = vst [vmem:[%s3212_s6 + $0x2c0] sm:$0xff] %v1697_v28  ;;  %v1710_v47 = vand.u32 2147483648, %v4410_v23  ;;  %2232 = vrsqrt.f32 %v1074_v49  ;;  %vm1709_vm5 = vcmp.eq.f32.partialorder %v4410_v23, 0.0 }
 0x1ce   : > { %v1704_v13 = vsel %vm1702_vm3, %v1703_v53, %v1701_v35  ;;  %v1706_v44 = vmul.f32 %v2223_v42, %v4410_v23  ;;  %v2225_v8 = vpop.eup %2224  ;;  %vm1714_vm6 = vcmp.eq.f32.partialorder %v4415_v3, inf  ;;  %v1717_v61 = vand.u32 2147483648, %v4415_v3 }
 0x1cf   : > { %1836 = vst [vmem:[%s3212_s6 + $0x2c8] sm:$0xff] %v1704_v13  ;;  %v1713_v18 = vmul.f32 %v2225_v8, %v4415_v3  ;;  %vm1716_vm7 = vcmp.eq.f32.partialorder %v4415_v3, 0.0  ;;  %vm1721_vm8 = vcmp.eq.f32.partialorder %v4422_v25, inf  ;;  %v1724_v62 = vand.u32 2147483648, %v4422_v25 }
 0x1d0   : > { %v2227_v12 = vpop.eup %2226  ;;  %v1708_v21 = vsel %vm1707_vm4, %v4410_v23, %v1706_v44  ;;  %vm1723_vm9 = vcmp.eq.f32.partialorder %v4422_v25, 0.0  ;;  %vm1728_vm10 = vcmp.eq.f32.partialorder %v1072_v52, inf  ;;  %v1731_v29 = vand.u32 2147483648, %v1072_v52 }
 0x1d1   : > { %v1711_v55 = vsel %vm1709_vm5, %v1710_v47, %v1708_v21  ;;  %v1720_v51 = vmul.f32 %v2227_v12, %v4422_v25  ;;  %v1715_v4 = vsel %vm1714_vm6, %v4415_v3, %v1713_v18  ;;  %vm1730_vm11 = vcmp.eq.f32.partialorder %v1072_v52, 0.0 }
 0x1d2   : > { %1837 = vst [vmem:[%s3212_s6 + $0x2d0] sm:$0xff] %v1711_v55  ;;  %v1718_v31 = vsel %vm1716_vm7, %v1717_v61, %v1715_v4  ;;  %vm1735_vm12 = vcmp.eq.f32.partialorder %v1073_v43, inf  ;;  %v1738_v46 = vand.u32 2147483648, %v1073_v43  ;;  %vm1737_vm13 = vcmp.eq.f32.partialorder %v1073_v43, 0.0 }
 0x1d3   : > { %v1722_v5 = vsel %vm1721_vm8, %v4422_v25, %v1720_v51  ;;  %1838 = vst [vmem:[%s3212_s6 + $0x2d8] sm:$0xff] %v1718_v31  ;;  %vm1742_vm14 = vcmp.eq.f32.partialorder %v1074_v49, inf  ;;  %v1745_v59 = vand.u32 2147483648, %v1074_v49  ;;  %vm1744_vm15 = vcmp.eq.f32.partialorder %v1074_v49, 0.0 }
 0x1d4   : > { %v1725_v45 = vsel %vm1723_vm9, %v1724_v62, %v1722_v5 }
 0x1d5   : > { %1839 = vst [vmem:[%s3212_s6 + $0x2e0] sm:$0xff] %v1725_v45  ;;  %v2229_v58 = vpop.eup %2228 }
 0x1d6   : > { %v2231_v41 = vpop.eup %2230  ;;  %v1727_v6 = vmul.f32 %v2229_v58, %v1072_v52 }
 0x1d7   : > { %v1734_v22 = vmul.f32 %v2231_v41, %v1073_v43  ;;  %v2233_v54 = vpop.eup %2232 }
 0x1d8   : > { %v1729_v50 = vsel %vm1728_vm10, %v1072_v52, %v1727_v6  ;;  %v1741_v60 = vmul.f32 %v2233_v54, %v1074_v49 }
 0x1d9   : > { %v1732_v23 = vsel %vm1730_vm11, %v1731_v29, %v1729_v50  ;;  %v1736_v38 = vsel %vm1735_vm12, %v1073_v43, %v1734_v22 }
 0x1da   : > { %v1739_v7 = vsel %vm1737_vm13, %v1738_v46, %v1736_v38  ;;  %1840 = vst [vmem:[%s3212_s6 + $0x2e8] sm:$0xff] %v1732_v23  ;;  %v1743_v3 = vsel %vm1742_vm14, %v1074_v49, %v1741_v60 }
 0x1db   : > { %1841 = vst [vmem:[%s3212_s6 + $0x2f0] sm:$0xff] %v1739_v7  ;;  %v1746_v11 = vsel %vm1744_vm15, %v1745_v59, %v1743_v3 }
 0x1dc   : > { %1842 = vst [vmem:[%s3212_s6 + $0x2f8] sm:$0xff] %v1746_v11 }
 0x1dd   : > { %2247 = shalt.err (!%p2244_p5)
}
 0x1de   : > { %s2248_s26 = scalar_lea.hbm %s4486_s16, 12288  ;;  %s2252_s29 = scalar_lea.hbm %s4542_s2, 24576 }
 0x1df   : > { %p2249_p6 = scmp.ne.s32.totalorder %s4486_s16, %s2248_s26  ;;  %p2253_p10 = scmp.lt.u32.totalorder %s4486_s16, %s4542_s2 }
 0x1e0   : > { %p2254_p11 = scmp.lt.u32.totalorder %s2252_s29, %s2248_s26  ;;  %p2256_p13 = scmp.lt.u32.totalorder %s2248_s26, %s4486_s16 }
 0x1e1   : > { %p2250_p7 = pnand %p2249_p6, %p2374_p4 }
 0x1e2   : > { %p2255_p12 = por %p2254_p11, %p2253_p10 }
 0x1e3   : > { %p2251_p9 = pneg %p2250_p7 }
 0x1e4   : > { %p2257_p0 = por %p2256_p13, %p2255_p12 }
 0x1e6   : > { %p2258_p1 = pnand %p2257_p0, %p2251_p9 }
 0x1e8   : > { %2261 = shalt.err (!%p2258_p1)
}
 0x1e9   : > { %s2317_s4 = smov 384   ;;  %s2318_s5 = smov 24  }
 0x1ea   : > { %1979 = dma.vmem_to_hbm [thread:$0]  (%p2374_p4), %s4488_s8, 12288, %s4486_s16, %s4494_s18, %s2317_s4, %s2317_s4, %s2318_s5  }
 0x1eb PF: > { %p1985_p2 = scmp.ge.s32.totalorder %s2312_s14, 2  ;;  %s1877_s6 = sand.u32 1, %s2292_s9  }
 0x1ec   : > { %s1878_s7 = scalar_lea.sflag [#allocation3], %s1877_s6 }
 0x1ed   : > { %p1982_p3 = pnand %p1985_p2, %p2381_p8 }
 0x1ef   : > { %2287 = dma.done.wait (!%p1982_p3), %s1878_s7, 12288  }
 0x1f0   : > { %2289 = vsyncadd (!%p1982_p3), %s1878_s7, 4294955008  ;;  %s15_s14 = sadd.s32 1, %s2312_s14   ;;  %s4687_s9 = smov %s2296_s10 }
 0x1f1   : > { %p12_p5 = scmp.ge.s32.totalorder %s15_s14, 4   ;;  %s4688_s10 = smov %s2300_s11 }
 0x1f2   : > { %s4689_s11 = smov %s2387_s22  ;;  %s4690_s12 = smov %s2308_s13 }
 0x1f3   : > { %s4691_s13 = smov %s4693_s17  ;;  %14 = sbr.rel (!%p12_p5) target bundleno = 4 (0x4), region = 66 }
 0x1fa   :  { %1883 = vsyncpa [#allocation3], 1 }
 0x1fb   :  { %1885 = vsyncpa [#allocation3 + $0x1], 1 }

</bundles_post_ra>
